<compile_context>
chip_gen: v7x
topology: tpu7x:2x2x1
jax: 0.10.0
libtpu: 0.0.40
codegen_flags: <defaults>
</compile_context>

<pallas_src>
import functools

import jax
import jax.numpy as jnp
from jax.experimental import pallas as pl
from jax.experimental.pallas import tpu as pltpu


def conv3x3_kernel(x_ref, w_ref, b_ref, o_ref, *, H, W):
    # x_ref: (Cin,  H*W)      flattened NCHW image for one batch element
    # w_ref: (Cout, 9*Cin)    weights, columns ordered (kh, kw, ci)
    # b_ref: (Cout, 1)        bias
    # o_ref: (Cout, H*W)      flattened output (lane-dense last dim)
    Cin, HW = x_ref.shape
    Cout = o_ref.shape[0]

    x = x_ref[...]                                   # (Cin, HW)
    w = w_ref[...]                                   # (Cout, 9*Cin)

    # Bias-initialized accumulator (saves a full VPU pass at the end).
    acc = jnp.broadcast_to(b_ref[...], (Cout, HW)).astype(jnp.float32)

    # Static per-lane coordinates for boundary masking of the halo taps.
    pos = jax.lax.broadcasted_iota(jnp.int32, (Cin, HW), 1)   # flat p = h*W + w
    col = pos % W                                             # w coordinate

    for kh in range(3):
        dh = kh - 1
        for kw in range(3):
            dw = kw - 1
            s = dh * W + dw                          # flat-index offset of this tap
            # rolled[p] = x[(p + s) mod HW]  (lane rotation on the XLU).
            rolled = pltpu.roll(x, shift=(-s) % HW, axis=1)
            # Zero out positions whose source pixel lies in the zero padding.
            valid = ((pos + s >= 0) & (pos + s < HW)
                     & (col + dw >= 0) & (col + dw < W))
            tap = jnp.where(valid, rolled, 0.0)      # (Cin, HW)
            # Channel contraction as Cin broadcast FMAs on the VPU (no MXU).
            for ci in range(Cin):
                t = (kh * 3 + kw) * Cin + ci
                acc = acc + tap[ci:ci + 1, :] * w[:, t:t + 1]

    o_ref[...] = acc.astype(o_ref.dtype)


def convolution_block_forward(x_nchw, w_oihw, bias):
    """ConvolutionBlock forward (Conv2d k=3, pad=1, bias=True) via Pallas."""
    N, Cin, H, W = x_nchw.shape
    Cout = w_oihw.shape[0]
    HW = H * W

    # Free row-major reshapes only -- no transpose / pad HBM passes on activations.
    x_flat = x_nchw.reshape(N, Cin, HW)
    # Parameter-sized (tiny) weight re-layout: (Cout, Cin, 3, 3) -> (Cout, 9*Cin),
    # columns ordered (kh, kw, ci) to match the kernel's tap loop.
    w_flat = jnp.transpose(w_oihw, (0, 2, 3, 1)).reshape(Cout, 9 * Cin)
    b_col = bias.reshape(Cout, 1)

    kernel = functools.partial(conv3x3_kernel, H=H, W=W)

    out_flat = pl.pallas_call(
        kernel,
        out_shape=jax.ShapeDtypeStruct((N, Cout, HW), jnp.float32),
        grid=(N,),
        in_specs=[
            pl.BlockSpec((None, Cin, HW), lambda n: (n, 0, 0)),
            pl.BlockSpec((Cout, 9 * Cin), lambda n: (0, 0)),
            pl.BlockSpec((Cout, 1), lambda n: (0, 0)),
        ],
        out_specs=pl.BlockSpec((None, Cout, HW), lambda n: (n, 0, 0)),
        compiler_params=pltpu.CompilerParams(
            dimension_semantics=("parallel",)),
    )(x_flat, w_flat, b_col)

    return out_flat.reshape(N, Cout, H, W)


if __name__ == "__main__":
    key = jax.random.PRNGKey(0)
    kx, kw, kb = jax.random.split(key, 3)

    N, Cin, H, W = 2, 4, 16, 16
    Cout, K = 4, 3

    x = jax.random.normal(kx, (N, Cin, H, W), dtype=jnp.float32)
    # Deterministic parameter init (roughly PyTorch-style uniform scale).
    fan_in = Cin * K * K
    bound = 1.0 / (fan_in ** 0.5)
    w = jax.random.uniform(kw, (Cout, Cin, K, K), jnp.float32, -bound, bound)
    b = jax.random.uniform(kb, (Cout,), jnp.float32, -bound, bound)

    out = convolution_block_forward(x, w, b)
    out = jax.block_until_ready(out)

    # Reference check against XLA's conv (same NCHW/OIHW semantics as PyTorch).
    ref = jax.lax.conv_general_dilated(
        x, w, window_strides=(1, 1), padding=((1, 1), (1, 1)),
        dimension_numbers=("NCHW", "OIHW", "NCHW"),
    ) + b.reshape(1, Cout, 1, 1)
    assert out.shape == (N, Cout, H, W)
    assert jnp.allclose(out, ref, atol=1e-4, rtol=1e-4)

    print("KERNEL_OK")
</pallas_src>

<mosaic_0001>
module attributes {stable_mosaic.version = 11 : i64} {
  func.func @conv3x3_kernel(%arg0: i32, %arg1: memref<1x4x256xf32, #tpu.memory_space<vmem>>, %arg2: memref<4x36xf32, #tpu.memory_space<vmem>>, %arg3: memref<4x1xf32, #tpu.memory_space<vmem>>, %arg4: memref<1x4x256xf32, #tpu.memory_space<vmem>>) attributes {dimension_semantics = [#tpu.dimension_semantics<parallel>], iteration_bounds = array<i64: 2>, scalar_prefetch = 0 : i64, scratch_operands = 0 : i64, tpu.core_type = #tpu.core_type<tc>, window_params = [{transform_indices = @transform_0, window_bounds = array<i64: 1, 4, 256>}, {pipeline_mode = #tpu.pipeline_mode<synchronous>, transform_indices = @transform_1, window_bounds = array<i64: 4, 36>}, {pipeline_mode = #tpu.pipeline_mode<synchronous>, transform_indices = @transform_2, window_bounds = array<i64: 4, 1>}, {transform_indices = @transform_3, window_bounds = array<i64: 1, 4, 256>}]} {
    %c0 = arith.constant 0 : index
    %c0_0 = arith.constant 0 : index
    %c0_1 = arith.constant 0 : index
    %0 = vector.load %arg1[%c0, %c0_0, %c0_1] : memref<1x4x256xf32, #tpu.memory_space<vmem>>, vector<1x4x256xf32>
    %1 = vector.shape_cast %0 : vector<1x4x256xf32> to vector<4x256xf32>
    %c0_2 = arith.constant 0 : index
    %c0_3 = arith.constant 0 : index
    %2 = vector.load %arg2[%c0_2, %c0_3] : memref<4x36xf32, #tpu.memory_space<vmem>>, vector<4x36xf32>
    %c0_4 = arith.constant 0 : index
    %c0_5 = arith.constant 0 : index
    %3 = vector.load %arg3[%c0_4, %c0_5] : memref<4x1xf32, #tpu.memory_space<vmem>>, vector<4x1xf32>
    %4 = vector.shape_cast %3 : vector<4x1xf32> to vector<4x1xf32>
    %5 = vector.broadcast %4 : vector<4x1xf32> to vector<4x256xf32>
    %6 = tpu.iota {dimensions = array<i32: 1>} : vector<4x256xi32>
    %c16_i32 = arith.constant 16 : i32
    %c0_i32 = arith.constant 0 : i32
    %7 = arith.cmpi eq, %c16_i32, %c0_i32 : i32
    %c1_i32 = arith.constant 1 : i32
    %8 = arith.select %7, %c1_i32, %c16_i32 : i32
    %9 = vector.broadcast %8 : i32 to vector<4x256xi32>
    %10 = arith.remsi %6, %9 : vector<4x256xi32>
    %c0_i32_6 = arith.constant 0 : i32
    %11 = vector.broadcast %c0_i32_6 : i32 to vector<4x256xi32>
    %12 = arith.cmpi ne, %10, %11 : vector<4x256xi32>
    %c0_i32_7 = arith.constant 0 : i32
    %13 = vector.broadcast %c0_i32_7 : i32 to vector<4x256xi32>
    %14 = arith.cmpi slt, %10, %13 : vector<4x256xi32>
    %c0_i32_8 = arith.constant 0 : i32
    %15 = arith.cmpi slt, %8, %c0_i32_8 : i32
    %16 = vector.broadcast %15 : i1 to vector<4x256xi1>
    %17 = vector.broadcast %16 : vector<4x256xi1> to vector<4x256xi1>
    %18 = arith.xori %14, %17 : vector<4x256xi1>
    %19 = arith.andi %18, %12 : vector<4x256xi1>
    %20 = vector.broadcast %8 : i32 to vector<4x256xi32>
    %21 = arith.addi %10, %20 : vector<4x256xi32>
    %22 = arith.select %19, %21, %10 : vector<4x256xi1>, vector<4x256xi32>
    %c17_i32 = arith.constant 17 : i32
    %23 = tpu.dynamic_rotate %1 by %c17_i32 dim 1 : vector<4x256xf32>, i32 -> vector<4x256xf32>
    %c-17_i32 = arith.constant -17 : i32
    %24 = vector.broadcast %c-17_i32 : i32 to vector<4x256xi32>
    %25 = arith.addi %6, %24 : vector<4x256xi32>
    %c0_i32_9 = arith.constant 0 : i32
    %26 = vector.broadcast %c0_i32_9 : i32 to vector<4x256xi32>
    %27 = arith.cmpi sge, %25, %26 : vector<4x256xi32>
    %c-17_i32_10 = arith.constant -17 : i32
    %28 = vector.broadcast %c-17_i32_10 : i32 to vector<4x256xi32>
    %29 = arith.addi %6, %28 : vector<4x256xi32>
    %c256_i32 = arith.constant 256 : i32
    %30 = vector.broadcast %c256_i32 : i32 to vector<4x256xi32>
    %31 = arith.cmpi slt, %29, %30 : vector<4x256xi32>
    %32 = arith.andi %27, %31 : vector<4x256xi1>
    %c-1_i32 = arith.constant -1 : i32
    %33 = vector.broadcast %c-1_i32 : i32 to vector<4x256xi32>
    %34 = arith.addi %22, %33 : vector<4x256xi32>
    %c0_i32_11 = arith.constant 0 : i32
    %35 = vector.broadcast %c0_i32_11 : i32 to vector<4x256xi32>
    %36 = arith.cmpi sge, %34, %35 : vector<4x256xi32>
    %37 = arith.andi %32, %36 : vector<4x256xi1>
    %c-1_i32_12 = arith.constant -1 : i32
    %38 = vector.broadcast %c-1_i32_12 : i32 to vector<4x256xi32>
    %39 = arith.addi %22, %38 : vector<4x256xi32>
    %c16_i32_13 = arith.constant 16 : i32
    %40 = vector.broadcast %c16_i32_13 : i32 to vector<4x256xi32>
    %41 = arith.cmpi slt, %39, %40 : vector<4x256xi32>
    %42 = arith.andi %37, %41 : vector<4x256xi1>
    %cst = arith.constant 0.000000e+00 : f32
    %43 = vector.broadcast %cst : f32 to vector<4x256xf32>
    %44 = arith.select %42, %23, %43 : vector<4x256xi1>, vector<4x256xf32>
    %45 = vector.extract_strided_slice %44 {offsets = [0, 0], sizes = [1, 256], strides = [1, 1]} : vector<4x256xf32> to vector<1x256xf32>
    %46 = vector.extract_strided_slice %2 {offsets = [0, 0], sizes = [4, 1], strides = [1, 1]} : vector<4x36xf32> to vector<4x1xf32>
    %47 = vector.broadcast %45 : vector<1x256xf32> to vector<4x256xf32>
    %48 = vector.broadcast %46 : vector<4x1xf32> to vector<4x256xf32>
    %49 = arith.mulf %47, %48 : vector<4x256xf32>
    %50 = arith.addf %5, %49 : vector<4x256xf32>
    %51 = vector.extract_strided_slice %44 {offsets = [1, 0], sizes = [1, 256], strides = [1, 1]} : vector<4x256xf32> to vector<1x256xf32>
    %52 = vector.extract_strided_slice %2 {offsets = [0, 1], sizes = [4, 1], strides = [1, 1]} : vector<4x36xf32> to vector<4x1xf32>
    %53 = vector.broadcast %51 : vector<1x256xf32> to vector<4x256xf32>
    %54 = vector.broadcast %52 : vector<4x1xf32> to vector<4x256xf32>
    %55 = arith.mulf %53, %54 : vector<4x256xf32>
    %56 = arith.addf %50, %55 : vector<4x256xf32>
    %57 = vector.extract_strided_slice %44 {offsets = [2, 0], sizes = [1, 256], strides = [1, 1]} : vector<4x256xf32> to vector<1x256xf32>
    %58 = vector.extract_strided_slice %2 {offsets = [0, 2], sizes = [4, 1], strides = [1, 1]} : vector<4x36xf32> to vector<4x1xf32>
    %59 = vector.broadcast %57 : vector<1x256xf32> to vector<4x256xf32>
    %60 = vector.broadcast %58 : vector<4x1xf32> to vector<4x256xf32>
    %61 = arith.mulf %59, %60 : vector<4x256xf32>
    %62 = arith.addf %56, %61 : vector<4x256xf32>
    %63 = vector.extract_strided_slice %44 {offsets = [3, 0], sizes = [1, 256], strides = [1, 1]} : vector<4x256xf32> to vector<1x256xf32>
    %64 = vector.extract_strided_slice %2 {offsets = [0, 3], sizes = [4, 1], strides = [1, 1]} : vector<4x36xf32> to vector<4x1xf32>
    %65 = vector.broadcast %63 : vector<1x256xf32> to vector<4x256xf32>
    %66 = vector.broadcast %64 : vector<4x1xf32> to vector<4x256xf32>
    %67 = arith.mulf %65, %66 : vector<4x256xf32>
    %68 = arith.addf %62, %67 : vector<4x256xf32>
    %c16_i32_14 = arith.constant 16 : i32
    %69 = tpu.dynamic_rotate %1 by %c16_i32_14 dim 1 : vector<4x256xf32>, i32 -> vector<4x256xf32>
    %c-16_i32 = arith.constant -16 : i32
    %70 = vector.broadcast %c-16_i32 : i32 to vector<4x256xi32>
    %71 = arith.addi %6, %70 : vector<4x256xi32>
    %c0_i32_15 = arith.constant 0 : i32
    %72 = vector.broadcast %c0_i32_15 : i32 to vector<4x256xi32>
    %73 = arith.cmpi sge, %71, %72 : vector<4x256xi32>
    %c-16_i32_16 = arith.constant -16 : i32
    %74 = vector.broadcast %c-16_i32_16 : i32 to vector<4x256xi32>
    %75 = arith.addi %6, %74 : vector<4x256xi32>
    %c256_i32_17 = arith.constant 256 : i32
    %76 = vector.broadcast %c256_i32_17 : i32 to vector<4x256xi32>
    %77 = arith.cmpi slt, %75, %76 : vector<4x256xi32>
    %78 = arith.andi %73, %77 : vector<4x256xi1>
    %c0_i32_18 = arith.constant 0 : i32
    %79 = vector.broadcast %c0_i32_18 : i32 to vector<4x256xi32>
    %80 = arith.addi %22, %79 : vector<4x256xi32>
    %c0_i32_19 = arith.constant 0 : i32
    %81 = vector.broadcast %c0_i32_19 : i32 to vector<4x256xi32>
    %82 = arith.cmpi sge, %80, %81 : vector<4x256xi32>
    %83 = arith.andi %78, %82 : vector<4x256xi1>
    %c0_i32_20 = arith.constant 0 : i32
    %84 = vector.broadcast %c0_i32_20 : i32 to vector<4x256xi32>
    %85 = arith.addi %22, %84 : vector<4x256xi32>
    %c16_i32_21 = arith.constant 16 : i32
    %86 = vector.broadcast %c16_i32_21 : i32 to vector<4x256xi32>
    %87 = arith.cmpi slt, %85, %86 : vector<4x256xi32>
    %88 = arith.andi %83, %87 : vector<4x256xi1>
    %cst_22 = arith.constant 0.000000e+00 : f32
    %89 = vector.broadcast %cst_22 : f32 to vector<4x256xf32>
    %90 = arith.select %88, %69, %89 : vector<4x256xi1>, vector<4x256xf32>
    %91 = vector.extract_strided_slice %90 {offsets = [0, 0], sizes = [1, 256], strides = [1, 1]} : vector<4x256xf32> to vector<1x256xf32>
    %92 = vector.extract_strided_slice %2 {offsets = [0, 4], sizes = [4, 1], strides = [1, 1]} : vector<4x36xf32> to vector<4x1xf32>
    %93 = vector.broadcast %91 : vector<1x256xf32> to vector<4x256xf32>
    %94 = vector.broadcast %92 : vector<4x1xf32> to vector<4x256xf32>
    %95 = arith.mulf %93, %94 : vector<4x256xf32>
    %96 = arith.addf %68, %95 : vector<4x256xf32>
    %97 = vector.extract_strided_slice %90 {offsets = [1, 0], sizes = [1, 256], strides = [1, 1]} : vector<4x256xf32> to vector<1x256xf32>
    %98 = vector.extract_strided_slice %2 {offsets = [0, 5], sizes = [4, 1], strides = [1, 1]} : vector<4x36xf32> to vector<4x1xf32>
    %99 = vector.broadcast %97 : vector<1x256xf32> to vector<4x256xf32>
    %100 = vector.broadcast %98 : vector<4x1xf32> to vector<4x256xf32>
    %101 = arith.mulf %99, %100 : vector<4x256xf32>
    %102 = arith.addf %96, %101 : vector<4x256xf32>
    %103 = vector.extract_strided_slice %90 {offsets = [2, 0], sizes = [1, 256], strides = [1, 1]} : vector<4x256xf32> to vector<1x256xf32>
    %104 = vector.extract_strided_slice %2 {offsets = [0, 6], sizes = [4, 1], strides = [1, 1]} : vector<4x36xf32> to vector<4x1xf32>
    %105 = vector.broadcast %103 : vector<1x256xf32> to vector<4x256xf32>
    %106 = vector.broadcast %104 : vector<4x1xf32> to vector<4x256xf32>
    %107 = arith.mulf %105, %106 : vector<4x256xf32>
    %108 = arith.addf %102, %107 : vector<4x256xf32>
    %109 = vector.extract_strided_slice %90 {offsets = [3, 0], sizes = [1, 256], strides = [1, 1]} : vector<4x256xf32> to vector<1x256xf32>
    %110 = vector.extract_strided_slice %2 {offsets = [0, 7], sizes = [4, 1], strides = [1, 1]} : vector<4x36xf32> to vector<4x1xf32>
    %111 = vector.broadcast %109 : vector<1x256xf32> to vector<4x256xf32>
    %112 = vector.broadcast %110 : vector<4x1xf32> to vector<4x256xf32>
    %113 = arith.mulf %111, %112 : vector<4x256xf32>
    %114 = arith.addf %108, %113 : vector<4x256xf32>
    %c15_i32 = arith.constant 15 : i32
    %115 = tpu.dynamic_rotate %1 by %c15_i32 dim 1 : vector<4x256xf32>, i32 -> vector<4x256xf32>
    %c-15_i32 = arith.constant -15 : i32
    %116 = vector.broadcast %c-15_i32 : i32 to vector<4x256xi32>
    %117 = arith.addi %6, %116 : vector<4x256xi32>
    %c0_i32_23 = arith.constant 0 : i32
    %118 = vector.broadcast %c0_i32_23 : i32 to vector<4x256xi32>
    %119 = arith.cmpi sge, %117, %118 : vector<4x256xi32>
    %c-15_i32_24 = arith.constant -15 : i32
    %120 = vector.broadcast %c-15_i32_24 : i32 to vector<4x256xi32>
    %121 = arith.addi %6, %120 : vector<4x256xi32>
    %c256_i32_25 = arith.constant 256 : i32
    %122 = vector.broadcast %c256_i32_25 : i32 to vector<4x256xi32>
    %123 = arith.cmpi slt, %121, %122 : vector<4x256xi32>
    %124 = arith.andi %119, %123 : vector<4x256xi1>
    %c1_i32_26 = arith.constant 1 : i32
    %125 = vector.broadcast %c1_i32_26 : i32 to vector<4x256xi32>
    %126 = arith.addi %22, %125 : vector<4x256xi32>
    %c0_i32_27 = arith.constant 0 : i32
    %127 = vector.broadcast %c0_i32_27 : i32 to vector<4x256xi32>
    %128 = arith.cmpi sge, %126, %127 : vector<4x256xi32>
    %129 = arith.andi %124, %128 : vector<4x256xi1>
    %c1_i32_28 = arith.constant 1 : i32
    %130 = vector.broadcast %c1_i32_28 : i32 to vector<4x256xi32>
    %131 = arith.addi %22, %130 : vector<4x256xi32>
    %c16_i32_29 = arith.constant 16 : i32
    %132 = vector.broadcast %c16_i32_29 : i32 to vector<4x256xi32>
    %133 = arith.cmpi slt, %131, %132 : vector<4x256xi32>
    %134 = arith.andi %129, %133 : vector<4x256xi1>
    %cst_30 = arith.constant 0.000000e+00 : f32
    %135 = vector.broadcast %cst_30 : f32 to vector<4x256xf32>
    %136 = arith.select %134, %115, %135 : vector<4x256xi1>, vector<4x256xf32>
    %137 = vector.extract_strided_slice %136 {offsets = [0, 0], sizes = [1, 256], strides = [1, 1]} : vector<4x256xf32> to vector<1x256xf32>
    %138 = vector.extract_strided_slice %2 {offsets = [0, 8], sizes = [4, 1], strides = [1, 1]} : vector<4x36xf32> to vector<4x1xf32>
    %139 = vector.broadcast %137 : vector<1x256xf32> to vector<4x256xf32>
    %140 = vector.broadcast %138 : vector<4x1xf32> to vector<4x256xf32>
    %141 = arith.mulf %139, %140 : vector<4x256xf32>
    %142 = arith.addf %114, %141 : vector<4x256xf32>
    %143 = vector.extract_strided_slice %136 {offsets = [1, 0], sizes = [1, 256], strides = [1, 1]} : vector<4x256xf32> to vector<1x256xf32>
    %144 = vector.extract_strided_slice %2 {offsets = [0, 9], sizes = [4, 1], strides = [1, 1]} : vector<4x36xf32> to vector<4x1xf32>
    %145 = vector.broadcast %143 : vector<1x256xf32> to vector<4x256xf32>
    %146 = vector.broadcast %144 : vector<4x1xf32> to vector<4x256xf32>
    %147 = arith.mulf %145, %146 : vector<4x256xf32>
    %148 = arith.addf %142, %147 : vector<4x256xf32>
    %149 = vector.extract_strided_slice %136 {offsets = [2, 0], sizes = [1, 256], strides = [1, 1]} : vector<4x256xf32> to vector<1x256xf32>
    %150 = vector.extract_strided_slice %2 {offsets = [0, 10], sizes = [4, 1], strides = [1, 1]} : vector<4x36xf32> to vector<4x1xf32>
    %151 = vector.broadcast %149 : vector<1x256xf32> to vector<4x256xf32>
    %152 = vector.broadcast %150 : vector<4x1xf32> to vector<4x256xf32>
    %153 = arith.mulf %151, %152 : vector<4x256xf32>
    %154 = arith.addf %148, %153 : vector<4x256xf32>
    %155 = vector.extract_strided_slice %136 {offsets = [3, 0], sizes = [1, 256], strides = [1, 1]} : vector<4x256xf32> to vector<1x256xf32>
    %156 = vector.extract_strided_slice %2 {offsets = [0, 11], sizes = [4, 1], strides = [1, 1]} : vector<4x36xf32> to vector<4x1xf32>
    %157 = vector.broadcast %155 : vector<1x256xf32> to vector<4x256xf32>
    %158 = vector.broadcast %156 : vector<4x1xf32> to vector<4x256xf32>
    %159 = arith.mulf %157, %158 : vector<4x256xf32>
    %160 = arith.addf %154, %159 : vector<4x256xf32>
    %c1_i32_31 = arith.constant 1 : i32
    %161 = tpu.dynamic_rotate %1 by %c1_i32_31 dim 1 : vector<4x256xf32>, i32 -> vector<4x256xf32>
    %c-1_i32_32 = arith.constant -1 : i32
    %162 = vector.broadcast %c-1_i32_32 : i32 to vector<4x256xi32>
    %163 = arith.addi %6, %162 : vector<4x256xi32>
    %c0_i32_33 = arith.constant 0 : i32
    %164 = vector.broadcast %c0_i32_33 : i32 to vector<4x256xi32>
    %165 = arith.cmpi sge, %163, %164 : vector<4x256xi32>
    %c-1_i32_34 = arith.constant -1 : i32
    %166 = vector.broadcast %c-1_i32_34 : i32 to vector<4x256xi32>
    %167 = arith.addi %6, %166 : vector<4x256xi32>
    %c256_i32_35 = arith.constant 256 : i32
    %168 = vector.broadcast %c256_i32_35 : i32 to vector<4x256xi32>
    %169 = arith.cmpi slt, %167, %168 : vector<4x256xi32>
    %170 = arith.andi %165, %169 : vector<4x256xi1>
    %c-1_i32_36 = arith.constant -1 : i32
    %171 = vector.broadcast %c-1_i32_36 : i32 to vector<4x256xi32>
    %172 = arith.addi %22, %171 : vector<4x256xi32>
    %c0_i32_37 = arith.constant 0 : i32
    %173 = vector.broadcast %c0_i32_37 : i32 to vector<4x256xi32>
    %174 = arith.cmpi sge, %172, %173 : vector<4x256xi32>
    %175 = arith.andi %170, %174 : vector<4x256xi1>
    %c-1_i32_38 = arith.constant -1 : i32
    %176 = vector.broadcast %c-1_i32_38 : i32 to vector<4x256xi32>
    %177 = arith.addi %22, %176 : vector<4x256xi32>
    %c16_i32_39 = arith.constant 16 : i32
    %178 = vector.broadcast %c16_i32_39 : i32 to vector<4x256xi32>
    %179 = arith.cmpi slt, %177, %178 : vector<4x256xi32>
    %180 = arith.andi %175, %179 : vector<4x256xi1>
    %cst_40 = arith.constant 0.000000e+00 : f32
    %181 = vector.broadcast %cst_40 : f32 to vector<4x256xf32>
    %182 = arith.select %180, %161, %181 : vector<4x256xi1>, vector<4x256xf32>
    %183 = vector.extract_strided_slice %182 {offsets = [0, 0], sizes = [1, 256], strides = [1, 1]} : vector<4x256xf32> to vector<1x256xf32>
    %184 = vector.extract_strided_slice %2 {offsets = [0, 12], sizes = [4, 1], strides = [1, 1]} : vector<4x36xf32> to vector<4x1xf32>
    %185 = vector.broadcast %183 : vector<1x256xf32> to vector<4x256xf32>
    %186 = vector.broadcast %184 : vector<4x1xf32> to vector<4x256xf32>
    %187 = arith.mulf %185, %186 : vector<4x256xf32>
    %188 = arith.addf %160, %187 : vector<4x256xf32>
    %189 = vector.extract_strided_slice %182 {offsets = [1, 0], sizes = [1, 256], strides = [1, 1]} : vector<4x256xf32> to vector<1x256xf32>
    %190 = vector.extract_strided_slice %2 {offsets = [0, 13], sizes = [4, 1], strides = [1, 1]} : vector<4x36xf32> to vector<4x1xf32>
    %191 = vector.broadcast %189 : vector<1x256xf32> to vector<4x256xf32>
    %192 = vector.broadcast %190 : vector<4x1xf32> to vector<4x256xf32>
    %193 = arith.mulf %191, %192 : vector<4x256xf32>
    %194 = arith.addf %188, %193 : vector<4x256xf32>
    %195 = vector.extract_strided_slice %182 {offsets = [2, 0], sizes = [1, 256], strides = [1, 1]} : vector<4x256xf32> to vector<1x256xf32>
    %196 = vector.extract_strided_slice %2 {offsets = [0, 14], sizes = [4, 1], strides = [1, 1]} : vector<4x36xf32> to vector<4x1xf32>
    %197 = vector.broadcast %195 : vector<1x256xf32> to vector<4x256xf32>
    %198 = vector.broadcast %196 : vector<4x1xf32> to vector<4x256xf32>
    %199 = arith.mulf %197, %198 : vector<4x256xf32>
    %200 = arith.addf %194, %199 : vector<4x256xf32>
    %201 = vector.extract_strided_slice %182 {offsets = [3, 0], sizes = [1, 256], strides = [1, 1]} : vector<4x256xf32> to vector<1x256xf32>
    %202 = vector.extract_strided_slice %2 {offsets = [0, 15], sizes = [4, 1], strides = [1, 1]} : vector<4x36xf32> to vector<4x1xf32>
    %203 = vector.broadcast %201 : vector<1x256xf32> to vector<4x256xf32>
    %204 = vector.broadcast %202 : vector<4x1xf32> to vector<4x256xf32>
    %205 = arith.mulf %203, %204 : vector<4x256xf32>
    %206 = arith.addf %200, %205 : vector<4x256xf32>
    %c0_i32_41 = arith.constant 0 : i32
    %207 = tpu.dynamic_rotate %1 by %c0_i32_41 dim 1 : vector<4x256xf32>, i32 -> vector<4x256xf32>
    %c0_i32_42 = arith.constant 0 : i32
    %208 = vector.broadcast %c0_i32_42 : i32 to vector<4x256xi32>
    %209 = arith.addi %6, %208 : vector<4x256xi32>
    %c0_i32_43 = arith.constant 0 : i32
    %210 = vector.broadcast %c0_i32_43 : i32 to vector<4x256xi32>
    %211 = arith.cmpi sge, %209, %210 : vector<4x256xi32>
    %c0_i32_44 = arith.constant 0 : i32
    %212 = vector.broadcast %c0_i32_44 : i32 to vector<4x256xi32>
    %213 = arith.addi %6, %212 : vector<4x256xi32>
    %c256_i32_45 = arith.constant 256 : i32
    %214 = vector.broadcast %c256_i32_45 : i32 to vector<4x256xi32>
    %215 = arith.cmpi slt, %213, %214 : vector<4x256xi32>
    %216 = arith.andi %211, %215 : vector<4x256xi1>
    %c0_i32_46 = arith.constant 0 : i32
    %217 = vector.broadcast %c0_i32_46 : i32 to vector<4x256xi32>
    %218 = arith.addi %22, %217 : vector<4x256xi32>
    %c0_i32_47 = arith.constant 0 : i32
    %219 = vector.broadcast %c0_i32_47 : i32 to vector<4x256xi32>
    %220 = arith.cmpi sge, %218, %219 : vector<4x256xi32>
    %221 = arith.andi %216, %220 : vector<4x256xi1>
    %c0_i32_48 = arith.constant 0 : i32
    %222 = vector.broadcast %c0_i32_48 : i32 to vector<4x256xi32>
    %223 = arith.addi %22, %222 : vector<4x256xi32>
    %c16_i32_49 = arith.constant 16 : i32
    %224 = vector.broadcast %c16_i32_49 : i32 to vector<4x256xi32>
    %225 = arith.cmpi slt, %223, %224 : vector<4x256xi32>
    %226 = arith.andi %221, %225 : vector<4x256xi1>
    %cst_50 = arith.constant 0.000000e+00 : f32
    %227 = vector.broadcast %cst_50 : f32 to vector<4x256xf32>
    %228 = arith.select %226, %207, %227 : vector<4x256xi1>, vector<4x256xf32>
    %229 = vector.extract_strided_slice %228 {offsets = [0, 0], sizes = [1, 256], strides = [1, 1]} : vector<4x256xf32> to vector<1x256xf32>
    %230 = vector.extract_strided_slice %2 {offsets = [0, 16], sizes = [4, 1], strides = [1, 1]} : vector<4x36xf32> to vector<4x1xf32>
    %231 = vector.broadcast %229 : vector<1x256xf32> to vector<4x256xf32>
    %232 = vector.broadcast %230 : vector<4x1xf32> to vector<4x256xf32>
    %233 = arith.mulf %231, %232 : vector<4x256xf32>
    %234 = arith.addf %206, %233 : vector<4x256xf32>
    %235 = vector.extract_strided_slice %228 {offsets = [1, 0], sizes = [1, 256], strides = [1, 1]} : vector<4x256xf32> to vector<1x256xf32>
    %236 = vector.extract_strided_slice %2 {offsets = [0, 17], sizes = [4, 1], strides = [1, 1]} : vector<4x36xf32> to vector<4x1xf32>
    %237 = vector.broadcast %235 : vector<1x256xf32> to vector<4x256xf32>
    %238 = vector.broadcast %236 : vector<4x1xf32> to vector<4x256xf32>
    %239 = arith.mulf %237, %238 : vector<4x256xf32>
    %240 = arith.addf %234, %239 : vector<4x256xf32>
    %241 = vector.extract_strided_slice %228 {offsets = [2, 0], sizes = [1, 256], strides = [1, 1]} : vector<4x256xf32> to vector<1x256xf32>
    %242 = vector.extract_strided_slice %2 {offsets = [0, 18], sizes = [4, 1], strides = [1, 1]} : vector<4x36xf32> to vector<4x1xf32>
    %243 = vector.broadcast %241 : vector<1x256xf32> to vector<4x256xf32>
    %244 = vector.broadcast %242 : vector<4x1xf32> to vector<4x256xf32>
    %245 = arith.mulf %243, %244 : vector<4x256xf32>
    %246 = arith.addf %240, %245 : vector<4x256xf32>
    %247 = vector.extract_strided_slice %228 {offsets = [3, 0], sizes = [1, 256], strides = [1, 1]} : vector<4x256xf32> to vector<1x256xf32>
    %248 = vector.extract_strided_slice %2 {offsets = [0, 19], sizes = [4, 1], strides = [1, 1]} : vector<4x36xf32> to vector<4x1xf32>
    %249 = vector.broadcast %247 : vector<1x256xf32> to vector<4x256xf32>
    %250 = vector.broadcast %248 : vector<4x1xf32> to vector<4x256xf32>
    %251 = arith.mulf %249, %250 : vector<4x256xf32>
    %252 = arith.addf %246, %251 : vector<4x256xf32>
    %c255_i32 = arith.constant 255 : i32
    %253 = tpu.dynamic_rotate %1 by %c255_i32 dim 1 : vector<4x256xf32>, i32 -> vector<4x256xf32>
    %c1_i32_51 = arith.constant 1 : i32
    %254 = vector.broadcast %c1_i32_51 : i32 to vector<4x256xi32>
    %255 = arith.addi %6, %254 : vector<4x256xi32>
    %c0_i32_52 = arith.constant 0 : i32
    %256 = vector.broadcast %c0_i32_52 : i32 to vector<4x256xi32>
    %257 = arith.cmpi sge, %255, %256 : vector<4x256xi32>
    %c1_i32_53 = arith.constant 1 : i32
    %258 = vector.broadcast %c1_i32_53 : i32 to vector<4x256xi32>
    %259 = arith.addi %6, %258 : vector<4x256xi32>
    %c256_i32_54 = arith.constant 256 : i32
    %260 = vector.broadcast %c256_i32_54 : i32 to vector<4x256xi32>
    %261 = arith.cmpi slt, %259, %260 : vector<4x256xi32>
    %262 = arith.andi %257, %261 : vector<4x256xi1>
    %c1_i32_55 = arith.constant 1 : i32
    %263 = vector.broadcast %c1_i32_55 : i32 to vector<4x256xi32>
    %264 = arith.addi %22, %263 : vector<4x256xi32>
    %c0_i32_56 = arith.constant 0 : i32
    %265 = vector.broadcast %c0_i32_56 : i32 to vector<4x256xi32>
    %266 = arith.cmpi sge, %264, %265 : vector<4x256xi32>
    %267 = arith.andi %262, %266 : vector<4x256xi1>
    %c1_i32_57 = arith.constant 1 : i32
    %268 = vector.broadcast %c1_i32_57 : i32 to vector<4x256xi32>
    %269 = arith.addi %22, %268 : vector<4x256xi32>
    %c16_i32_58 = arith.constant 16 : i32
    %270 = vector.broadcast %c16_i32_58 : i32 to vector<4x256xi32>
    %271 = arith.cmpi slt, %269, %270 : vector<4x256xi32>
    %272 = arith.andi %267, %271 : vector<4x256xi1>
    %cst_59 = arith.constant 0.000000e+00 : f32
    %273 = vector.broadcast %cst_59 : f32 to vector<4x256xf32>
    %274 = arith.select %272, %253, %273 : vector<4x256xi1>, vector<4x256xf32>
    %275 = vector.extract_strided_slice %274 {offsets = [0, 0], sizes = [1, 256], strides = [1, 1]} : vector<4x256xf32> to vector<1x256xf32>
    %276 = vector.extract_strided_slice %2 {offsets = [0, 20], sizes = [4, 1], strides = [1, 1]} : vector<4x36xf32> to vector<4x1xf32>
    %277 = vector.broadcast %275 : vector<1x256xf32> to vector<4x256xf32>
    %278 = vector.broadcast %276 : vector<4x1xf32> to vector<4x256xf32>
    %279 = arith.mulf %277, %278 : vector<4x256xf32>
    %280 = arith.addf %252, %279 : vector<4x256xf32>
    %281 = vector.extract_strided_slice %274 {offsets = [1, 0], sizes = [1, 256], strides = [1, 1]} : vector<4x256xf32> to vector<1x256xf32>
    %282 = vector.extract_strided_slice %2 {offsets = [0, 21], sizes = [4, 1], strides = [1, 1]} : vector<4x36xf32> to vector<4x1xf32>
    %283 = vector.broadcast %281 : vector<1x256xf32> to vector<4x256xf32>
    %284 = vector.broadcast %282 : vector<4x1xf32> to vector<4x256xf32>
    %285 = arith.mulf %283, %284 : vector<4x256xf32>
    %286 = arith.addf %280, %285 : vector<4x256xf32>
    %287 = vector.extract_strided_slice %274 {offsets = [2, 0], sizes = [1, 256], strides = [1, 1]} : vector<4x256xf32> to vector<1x256xf32>
    %288 = vector.extract_strided_slice %2 {offsets = [0, 22], sizes = [4, 1], strides = [1, 1]} : vector<4x36xf32> to vector<4x1xf32>
    %289 = vector.broadcast %287 : vector<1x256xf32> to vector<4x256xf32>
    %290 = vector.broadcast %288 : vector<4x1xf32> to vector<4x256xf32>
    %291 = arith.mulf %289, %290 : vector<4x256xf32>
    %292 = arith.addf %286, %291 : vector<4x256xf32>
    %293 = vector.extract_strided_slice %274 {offsets = [3, 0], sizes = [1, 256], strides = [1, 1]} : vector<4x256xf32> to vector<1x256xf32>
    %294 = vector.extract_strided_slice %2 {offsets = [0, 23], sizes = [4, 1], strides = [1, 1]} : vector<4x36xf32> to vector<4x1xf32>
    %295 = vector.broadcast %293 : vector<1x256xf32> to vector<4x256xf32>
    %296 = vector.broadcast %294 : vector<4x1xf32> to vector<4x256xf32>
    %297 = arith.mulf %295, %296 : vector<4x256xf32>
    %298 = arith.addf %292, %297 : vector<4x256xf32>
    %c241_i32 = arith.constant 241 : i32
    %299 = tpu.dynamic_rotate %1 by %c241_i32 dim 1 : vector<4x256xf32>, i32 -> vector<4x256xf32>
    %c15_i32_60 = arith.constant 15 : i32
    %300 = vector.broadcast %c15_i32_60 : i32 to vector<4x256xi32>
    %301 = arith.addi %6, %300 : vector<4x256xi32>
    %c0_i32_61 = arith.constant 0 : i32
    %302 = vector.broadcast %c0_i32_61 : i32 to vector<4x256xi32>
    %303 = arith.cmpi sge, %301, %302 : vector<4x256xi32>
    %c15_i32_62 = arith.constant 15 : i32
    %304 = vector.broadcast %c15_i32_62 : i32 to vector<4x256xi32>
    %305 = arith.addi %6, %304 : vector<4x256xi32>
    %c256_i32_63 = arith.constant 256 : i32
    %306 = vector.broadcast %c256_i32_63 : i32 to vector<4x256xi32>
    %307 = arith.cmpi slt, %305, %306 : vector<4x256xi32>
    %308 = arith.andi %303, %307 : vector<4x256xi1>
    %c-1_i32_64 = arith.constant -1 : i32
    %309 = vector.broadcast %c-1_i32_64 : i32 to vector<4x256xi32>
    %310 = arith.addi %22, %309 : vector<4x256xi32>
    %c0_i32_65 = arith.constant 0 : i32
    %311 = vector.broadcast %c0_i32_65 : i32 to vector<4x256xi32>
    %312 = arith.cmpi sge, %310, %311 : vector<4x256xi32>
    %313 = arith.andi %308, %312 : vector<4x256xi1>
    %c-1_i32_66 = arith.constant -1 : i32
    %314 = vector.broadcast %c-1_i32_66 : i32 to vector<4x256xi32>
    %315 = arith.addi %22, %314 : vector<4x256xi32>
    %c16_i32_67 = arith.constant 16 : i32
    %316 = vector.broadcast %c16_i32_67 : i32 to vector<4x256xi32>
    %317 = arith.cmpi slt, %315, %316 : vector<4x256xi32>
    %318 = arith.andi %313, %317 : vector<4x256xi1>
    %cst_68 = arith.constant 0.000000e+00 : f32
    %319 = vector.broadcast %cst_68 : f32 to vector<4x256xf32>
    %320 = arith.select %318, %299, %319 : vector<4x256xi1>, vector<4x256xf32>
    %321 = vector.extract_strided_slice %320 {offsets = [0, 0], sizes = [1, 256], strides = [1, 1]} : vector<4x256xf32> to vector<1x256xf32>
    %322 = vector.extract_strided_slice %2 {offsets = [0, 24], sizes = [4, 1], strides = [1, 1]} : vector<4x36xf32> to vector<4x1xf32>
    %323 = vector.broadcast %321 : vector<1x256xf32> to vector<4x256xf32>
    %324 = vector.broadcast %322 : vector<4x1xf32> to vector<4x256xf32>
    %325 = arith.mulf %323, %324 : vector<4x256xf32>
    %326 = arith.addf %298, %325 : vector<4x256xf32>
    %327 = vector.extract_strided_slice %320 {offsets = [1, 0], sizes = [1, 256], strides = [1, 1]} : vector<4x256xf32> to vector<1x256xf32>
    %328 = vector.extract_strided_slice %2 {offsets = [0, 25], sizes = [4, 1], strides = [1, 1]} : vector<4x36xf32> to vector<4x1xf32>
    %329 = vector.broadcast %327 : vector<1x256xf32> to vector<4x256xf32>
    %330 = vector.broadcast %328 : vector<4x1xf32> to vector<4x256xf32>
    %331 = arith.mulf %329, %330 : vector<4x256xf32>
    %332 = arith.addf %326, %331 : vector<4x256xf32>
    %333 = vector.extract_strided_slice %320 {offsets = [2, 0], sizes = [1, 256], strides = [1, 1]} : vector<4x256xf32> to vector<1x256xf32>
    %334 = vector.extract_strided_slice %2 {offsets = [0, 26], sizes = [4, 1], strides = [1, 1]} : vector<4x36xf32> to vector<4x1xf32>
    %335 = vector.broadcast %333 : vector<1x256xf32> to vector<4x256xf32>
    %336 = vector.broadcast %334 : vector<4x1xf32> to vector<4x256xf32>
    %337 = arith.mulf %335, %336 : vector<4x256xf32>
    %338 = arith.addf %332, %337 : vector<4x256xf32>
    %339 = vector.extract_strided_slice %320 {offsets = [3, 0], sizes = [1, 256], strides = [1, 1]} : vector<4x256xf32> to vector<1x256xf32>
    %340 = vector.extract_strided_slice %2 {offsets = [0, 27], sizes = [4, 1], strides = [1, 1]} : vector<4x36xf32> to vector<4x1xf32>
    %341 = vector.broadcast %339 : vector<1x256xf32> to vector<4x256xf32>
    %342 = vector.broadcast %340 : vector<4x1xf32> to vector<4x256xf32>
    %343 = arith.mulf %341, %342 : vector<4x256xf32>
    %344 = arith.addf %338, %343 : vector<4x256xf32>
    %c240_i32 = arith.constant 240 : i32
    %345 = tpu.dynamic_rotate %1 by %c240_i32 dim 1 : vector<4x256xf32>, i32 -> vector<4x256xf32>
    %c16_i32_69 = arith.constant 16 : i32
    %346 = vector.broadcast %c16_i32_69 : i32 to vector<4x256xi32>
    %347 = arith.addi %6, %346 : vector<4x256xi32>
    %c0_i32_70 = arith.constant 0 : i32
    %348 = vector.broadcast %c0_i32_70 : i32 to vector<4x256xi32>
    %349 = arith.cmpi sge, %347, %348 : vector<4x256xi32>
    %c16_i32_71 = arith.constant 16 : i32
    %350 = vector.broadcast %c16_i32_71 : i32 to vector<4x256xi32>
    %351 = arith.addi %6, %350 : vector<4x256xi32>
    %c256_i32_72 = arith.constant 256 : i32
    %352 = vector.broadcast %c256_i32_72 : i32 to vector<4x256xi32>
    %353 = arith.cmpi slt, %351, %352 : vector<4x256xi32>
    %354 = arith.andi %349, %353 : vector<4x256xi1>
    %c0_i32_73 = arith.constant 0 : i32
    %355 = vector.broadcast %c0_i32_73 : i32 to vector<4x256xi32>
    %356 = arith.addi %22, %355 : vector<4x256xi32>
    %c0_i32_74 = arith.constant 0 : i32
    %357 = vector.broadcast %c0_i32_74 : i32 to vector<4x256xi32>
    %358 = arith.cmpi sge, %356, %357 : vector<4x256xi32>
    %359 = arith.andi %354, %358 : vector<4x256xi1>
    %c0_i32_75 = arith.constant 0 : i32
    %360 = vector.broadcast %c0_i32_75 : i32 to vector<4x256xi32>
    %361 = arith.addi %22, %360 : vector<4x256xi32>
    %c16_i32_76 = arith.constant 16 : i32
    %362 = vector.broadcast %c16_i32_76 : i32 to vector<4x256xi32>
    %363 = arith.cmpi slt, %361, %362 : vector<4x256xi32>
    %364 = arith.andi %359, %363 : vector<4x256xi1>
    %cst_77 = arith.constant 0.000000e+00 : f32
    %365 = vector.broadcast %cst_77 : f32 to vector<4x256xf32>
    %366 = arith.select %364, %345, %365 : vector<4x256xi1>, vector<4x256xf32>
    %367 = vector.extract_strided_slice %366 {offsets = [0, 0], sizes = [1, 256], strides = [1, 1]} : vector<4x256xf32> to vector<1x256xf32>
    %368 = vector.extract_strided_slice %2 {offsets = [0, 28], sizes = [4, 1], strides = [1, 1]} : vector<4x36xf32> to vector<4x1xf32>
    %369 = vector.broadcast %367 : vector<1x256xf32> to vector<4x256xf32>
    %370 = vector.broadcast %368 : vector<4x1xf32> to vector<4x256xf32>
    %371 = arith.mulf %369, %370 : vector<4x256xf32>
    %372 = arith.addf %344, %371 : vector<4x256xf32>
    %373 = vector.extract_strided_slice %366 {offsets = [1, 0], sizes = [1, 256], strides = [1, 1]} : vector<4x256xf32> to vector<1x256xf32>
    %374 = vector.extract_strided_slice %2 {offsets = [0, 29], sizes = [4, 1], strides = [1, 1]} : vector<4x36xf32> to vector<4x1xf32>
    %375 = vector.broadcast %373 : vector<1x256xf32> to vector<4x256xf32>
    %376 = vector.broadcast %374 : vector<4x1xf32> to vector<4x256xf32>
    %377 = arith.mulf %375, %376 : vector<4x256xf32>
    %378 = arith.addf %372, %377 : vector<4x256xf32>
    %379 = vector.extract_strided_slice %366 {offsets = [2, 0], sizes = [1, 256], strides = [1, 1]} : vector<4x256xf32> to vector<1x256xf32>
    %380 = vector.extract_strided_slice %2 {offsets = [0, 30], sizes = [4, 1], strides = [1, 1]} : vector<4x36xf32> to vector<4x1xf32>
    %381 = vector.broadcast %379 : vector<1x256xf32> to vector<4x256xf32>
    %382 = vector.broadcast %380 : vector<4x1xf32> to vector<4x256xf32>
    %383 = arith.mulf %381, %382 : vector<4x256xf32>
    %384 = arith.addf %378, %383 : vector<4x256xf32>
    %385 = vector.extract_strided_slice %366 {offsets = [3, 0], sizes = [1, 256], strides = [1, 1]} : vector<4x256xf32> to vector<1x256xf32>
    %386 = vector.extract_strided_slice %2 {offsets = [0, 31], sizes = [4, 1], strides = [1, 1]} : vector<4x36xf32> to vector<4x1xf32>
    %387 = vector.broadcast %385 : vector<1x256xf32> to vector<4x256xf32>
    %388 = vector.broadcast %386 : vector<4x1xf32> to vector<4x256xf32>
    %389 = arith.mulf %387, %388 : vector<4x256xf32>
    %390 = arith.addf %384, %389 : vector<4x256xf32>
    %c239_i32 = arith.constant 239 : i32
    %391 = tpu.dynamic_rotate %1 by %c239_i32 dim 1 : vector<4x256xf32>, i32 -> vector<4x256xf32>
    %c17_i32_78 = arith.constant 17 : i32
    %392 = vector.broadcast %c17_i32_78 : i32 to vector<4x256xi32>
    %393 = arith.addi %6, %392 : vector<4x256xi32>
    %c0_i32_79 = arith.constant 0 : i32
    %394 = vector.broadcast %c0_i32_79 : i32 to vector<4x256xi32>
    %395 = arith.cmpi sge, %393, %394 : vector<4x256xi32>
    %c17_i32_80 = arith.constant 17 : i32
    %396 = vector.broadcast %c17_i32_80 : i32 to vector<4x256xi32>
    %397 = arith.addi %6, %396 : vector<4x256xi32>
    %c256_i32_81 = arith.constant 256 : i32
    %398 = vector.broadcast %c256_i32_81 : i32 to vector<4x256xi32>
    %399 = arith.cmpi slt, %397, %398 : vector<4x256xi32>
    %400 = arith.andi %395, %399 : vector<4x256xi1>
    %c1_i32_82 = arith.constant 1 : i32
    %401 = vector.broadcast %c1_i32_82 : i32 to vector<4x256xi32>
    %402 = arith.addi %22, %401 : vector<4x256xi32>
    %c0_i32_83 = arith.constant 0 : i32
    %403 = vector.broadcast %c0_i32_83 : i32 to vector<4x256xi32>
    %404 = arith.cmpi sge, %402, %403 : vector<4x256xi32>
    %405 = arith.andi %400, %404 : vector<4x256xi1>
    %c1_i32_84 = arith.constant 1 : i32
    %406 = vector.broadcast %c1_i32_84 : i32 to vector<4x256xi32>
    %407 = arith.addi %22, %406 : vector<4x256xi32>
    %c16_i32_85 = arith.constant 16 : i32
    %408 = vector.broadcast %c16_i32_85 : i32 to vector<4x256xi32>
    %409 = arith.cmpi slt, %407, %408 : vector<4x256xi32>
    %410 = arith.andi %405, %409 : vector<4x256xi1>
    %cst_86 = arith.constant 0.000000e+00 : f32
    %411 = vector.broadcast %cst_86 : f32 to vector<4x256xf32>
    %412 = arith.select %410, %391, %411 : vector<4x256xi1>, vector<4x256xf32>
    %413 = vector.extract_strided_slice %412 {offsets = [0, 0], sizes = [1, 256], strides = [1, 1]} : vector<4x256xf32> to vector<1x256xf32>
    %414 = vector.extract_strided_slice %2 {offsets = [0, 32], sizes = [4, 1], strides = [1, 1]} : vector<4x36xf32> to vector<4x1xf32>
    %415 = vector.broadcast %413 : vector<1x256xf32> to vector<4x256xf32>
    %416 = vector.broadcast %414 : vector<4x1xf32> to vector<4x256xf32>
    %417 = arith.mulf %415, %416 : vector<4x256xf32>
    %418 = arith.addf %390, %417 : vector<4x256xf32>
    %419 = vector.extract_strided_slice %412 {offsets = [1, 0], sizes = [1, 256], strides = [1, 1]} : vector<4x256xf32> to vector<1x256xf32>
    %420 = vector.extract_strided_slice %2 {offsets = [0, 33], sizes = [4, 1], strides = [1, 1]} : vector<4x36xf32> to vector<4x1xf32>
    %421 = vector.broadcast %419 : vector<1x256xf32> to vector<4x256xf32>
    %422 = vector.broadcast %420 : vector<4x1xf32> to vector<4x256xf32>
    %423 = arith.mulf %421, %422 : vector<4x256xf32>
    %424 = arith.addf %418, %423 : vector<4x256xf32>
    %425 = vector.extract_strided_slice %412 {offsets = [2, 0], sizes = [1, 256], strides = [1, 1]} : vector<4x256xf32> to vector<1x256xf32>
    %426 = vector.extract_strided_slice %2 {offsets = [0, 34], sizes = [4, 1], strides = [1, 1]} : vector<4x36xf32> to vector<4x1xf32>
    %427 = vector.broadcast %425 : vector<1x256xf32> to vector<4x256xf32>
    %428 = vector.broadcast %426 : vector<4x1xf32> to vector<4x256xf32>
    %429 = arith.mulf %427, %428 : vector<4x256xf32>
    %430 = arith.addf %424, %429 : vector<4x256xf32>
    %431 = vector.extract_strided_slice %412 {offsets = [3, 0], sizes = [1, 256], strides = [1, 1]} : vector<4x256xf32> to vector<1x256xf32>
    %432 = vector.extract_strided_slice %2 {offsets = [0, 35], sizes = [4, 1], strides = [1, 1]} : vector<4x36xf32> to vector<4x1xf32>
    %433 = vector.broadcast %431 : vector<1x256xf32> to vector<4x256xf32>
    %434 = vector.broadcast %432 : vector<4x1xf32> to vector<4x256xf32>
    %435 = arith.mulf %433, %434 : vector<4x256xf32>
    %436 = arith.addf %430, %435 : vector<4x256xf32>
    %c0_87 = arith.constant 0 : index
    %c0_88 = arith.constant 0 : index
    %c0_89 = arith.constant 0 : index
    %437 = vector.load %arg4[%c0_87, %c0_88, %c0_89] : memref<1x4x256xf32, #tpu.memory_space<vmem>>, vector<1x4x256xf32>
    %438 = vector.shape_cast %437 : vector<1x4x256xf32> to vector<4x256xf32>
    %439 = vector.shape_cast %436 : vector<4x256xf32> to vector<1x4x256xf32>
    tpu.vector_store %arg4[%c0_87, %c0_88, %c0_89], %439 {strides = array<i32>} : memref<1x4x256xf32, #tpu.memory_space<vmem>>, vector<1x4x256xf32>,
    return
  }
  func.func @transform_0(%arg0: i32) -> (i32, i32, i32) {
    %c0_i32 = arith.constant 0 : i32
    %c0_i32_0 = arith.constant 0 : i32
    %c0_i32_1 = arith.constant 0 : i32
    return %arg0, %c0_i32, %c0_i32_0 : i32, i32, i32
  }
  func.func @transform_1(%arg0: i32) -> (i32, i32) {
    %c0_i32 = arith.constant 0 : i32
    %c0_i32_0 = arith.constant 0 : i32
    %c0_i32_1 = arith.constant 0 : i32
    return %c0_i32, %c0_i32_0 : i32, i32
  }
  func.func @transform_2(%arg0: i32) -> (i32, i32) {
    %c0_i32 = arith.constant 0 : i32
    %c0_i32_0 = arith.constant 0 : i32
    %c0_i32_1 = arith.constant 0 : i32
    return %c0_i32, %c0_i32_0 : i32, i32
  }
  func.func @transform_3(%arg0: i32) -> (i32, i32, i32) {
    %c0_i32 = arith.constant 0 : i32
    %c0_i32_0 = arith.constant 0 : i32
    %c0_i32_1 = arith.constant 0 : i32
    return %arg0, %c0_i32, %c0_i32_0 : i32, i32, i32
  }
}

</mosaic_0001>

<bundles_post_ra>
// kernel: tpu_custom_call.1
= control target key start
LH: loop header
LB: loop body
LE: loop exit
PB: predicated region body
PF: predicated region fallthrough
CT: control target
= control target key end

     0   :  { %8 = vsyncpa [#allocation3], 0  ;;  %s1787_s0 = inlined_call_operand.hbm [shape: f32[2,4,256], index: 0, kind: input, shape index: {}]   ;;  %s1788_s1 = inlined_call_operand.vmem [shape: f32[4,36], index: 1, kind: input, shape index: {}]   ;;  %s1789_s2 = inlined_call_operand.vmem [shape: f32[4,1], index: 2, kind: input, shape index: {}]   ;;  %s1790_s3 = inlined_call_operand.hbm [shape: f32[2,4,256], index: 3, kind: output, shape index: {}]  }
   0x1   :  { %10 = vsyncpa [#allocation3 + $0x1], 0 }
   0x2   :  { %11 = vsyncpa [#allocation4], 0 }
   0x3   :  { %13 = vsyncpa [#allocation4 + $0x1], 0  ;;  %s1397_s12 = smov 0   ;;  %s1399_s13 = smov 0  }
   0x4   :  { %s1401_s14 = smov 0   ;;  %s1403_s15 = smov 0  }
   0x5 LB: > { %s1418_s16 = sadd.s32 4294967295, %s1329_s15   ;;  %s1088_s17 = sadd.s32 4294967294, %s1329_s15   ;;  %s1329_s15 = sphi %s1403_s15, %s1805_s15   ;;  %s1325_s14 = sphi %s1401_s14, %s1804_s14   ;;  %s1321_s13 = sphi %s1399_s13, %s1803_s13   ;;  %s1317_s12 = sphi %s1397_s12, %s1802_s12  }
   0x6   : > { %s1422_s18 = sadd.s32 1, %s1329_s15   ;;  %s26_s19 = sadd.s32 1, %s1325_s14 }
   0x7   : > { %s23_s20 = ssub.s32 %s1329_s15, %s1422_s18  ;;  %p33_p0 = scmp.ne.s32.totalorder %s1325_s14, %s1321_s13 }
   0x8   : > { %p24_p1 = scmp.eq.s32.totalorder %s23_s20, 0  ;;  %p34_p2 = scmp.eq.s32.totalorder %s1329_s15, 0 }
   0x9   : > { %p39_p3 = scmp.ne.s32.totalorder %s1321_s13, %s1317_s12  ;;  %p40_p4 = scmp.eq.s32.totalorder %s1418_s16, 0 }
   0xa   : > { %s1434_s21 = scalar_select %p24_p1, %s1325_s14, %s26_s19  }
   0xb   : > { %p1436_p5 = por %p34_p2, %p33_p0  ;;  %p1440_p6 = por %p40_p4, %p39_p3 }
   0xc   : > { %p105_p7 = scmp.eq.s32.totalorder %s1418_s16, 1  ;;  %p111_p8 = scmp.eq.s32.totalorder %s1088_s17, 1 }
   0xd   : > { %p1116_p10 = scmp.lt.s32.totalorder %s1329_s15, 2  ;;  %s137_s26 = sand.u32 1, %s1325_s14  }
   0xe   : > { %p1447_p11 = por %p105_p7, %p33_p0  ;;  %p1451_p12 = por %p111_p8, %p39_p3 }
   0xf   : > { %s1102_s27 = sshll.u32 %s1329_s15, 7  ;;  %s1091_s28 = sshll.u32 %s137_s26, 3 }
  0x10   : > { %s1794_s24 = scalar_select %p1447_p11, 1, 0 }
  0x11   : > { %s1795_s25 = scalar_select %p1451_p12, 1, 0 }
  0x12   : > { %s1460_s4 = scalar_lea.hbm %s1787_s0, %s1102_s27  ;;  %s141_s5 = scalar_lea.vmem [#allocation2], %s1091_s28 }
  0x13   : > { %s149_s6 = sshll.u32 %s141_s5, 4  ;;  %p1464_p13 = pnand %p1116_p10, %p1436_p5  ;;  %s1468_s6 = int_to_ptr.vmem [resolvable:$true] %s149_s6 }
  0x14   : > { %s138_s8 = scalar_lea.sflag [#allocation3], %s137_s26  ;;  %s1233_s9 = scalar_lea.hbm %s1460_s4, 128 }
  0x15   : > { %p1234_p2 = scmp.ne.s32.totalorder %s1460_s4, %s1233_s9  ;;  %p1235_p3 = pneg %p1464_p13 }
  0x16   : > { %s1238_s17 = scalar_lea.hbm %s1787_s0, 256  ;;  %p1239_p5 = scmp.lt.u32.totalorder %s1460_s4, %s1787_s0 }
  0x17   : > { %p1236_p4 = pnand %p1235_p3, %p1234_p2  ;;  %p1240_p8 = scmp.lt.u32.totalorder %s1238_s17, %s1233_s9 }
  0x18   : > { %p1242_p9 = scmp.lt.u32.totalorder %s1233_s9, %s1460_s4 }
  0x19   : > { %p1237_p7 = pneg %p1236_p4  ;;  %p1241_p10 = por %p1240_p8, %p1239_p5 }
  0x1b   : > { %p1243_p0 = por %p1242_p9, %p1241_p10 }
  0x1d   : > { %p1244_p1 = pnand %p1243_p0, %p1237_p7 }
  0x1f   : > { %1247 = shalt.err (!%p1244_p1)
}
  0x20   : > { %s1248_s22 = scalar_lea.vmem %s1468_s6, 128  ;;  %s1331_s26 = smov [#allocation2]  }
  0x21   : > { %p1249_p2 = scmp.ne.s32.totalorder %s1468_s6, %s1248_s22  ;;  %s1253_s27 = sshll.u32 %s1331_s26, 4  ;;  %s1254_s27 = int_to_ptr.vmem [resolvable:$false] %s1253_s27 }
  0x22   : > { %s1255_s28 = scalar_lea.vmem %s1254_s27, 256  ;;  %p1256_p11 = scmp.lt.s32.totalorder %s1468_s6, %s1254_s27 }
  0x23   : > { %p1251_p4 = pnand %p1249_p2, %p1235_p3  ;;  %p1257_p5 = scmp.lt.s32.totalorder %s1255_s28, %s1248_s22 }
  0x25   : > { %p1252_p12 = pneg %p1251_p4  ;;  %p1258_p8 = por %p1257_p5, %p1256_p11 }
  0x27   : > { %p1259_p9 = pnand %p1258_p8, %p1252_p12 }
  0x29   : > { %1262 = shalt.err (!%p1259_p9)
}
  0x2a   : > { %1111 = dma.hbm_to_vmem [thread:$0]  (!%p1464_p13), %s1460_s4, 128, %s1468_s6, %s138_s8  }
  0x2b   : > { %p1797_p0 = scmp.lt.s32.totalorder %s1329_s15, 3  ;;  %p1798_p1 = scmp.ge.s32.totalorder %s1329_s15, 1 }
  0x2d   : > { %p155_p3 = pnand %p1798_p1, %p1797_p0 }
  0x2e   : > { %s1502_s29 = sand.u32 (!%p155_p3), 1, %s1321_s13  }
  0x2f   : > { %158 = sbr.rel (%p155_p3) target bundleno = 352 (0x160), region = 32  ;;  %s1095_s30 = sshll.u32 (!%p155_p3), %s1502_s29, 3 }
  0x30   : > { %s161_s5 = scalar_lea.sflag (!%p155_p3), [#allocation3], %s1502_s29  ;;  %s164_s7 = scalar_lea.vmem (!%p155_p3), [#allocation2], %s1095_s30 }
  0x36   : > { %1308 = dma.done.wait (%p1440_p6), %s161_s5, 128  }
  0x37   : > { %1310 = vsyncadd (%p1440_p6), %s161_s5, 4294967168  ;;  %v1332_v0 = vmov 0   ;;  %v1515_v1 = vld [vmem:[%s1788_s1] sm:$0xf]  ;;  %v1333_v4 = vmov 2   ;;  %s1334_s23 = smov 17   ;;  %v195_v38 = vlaneseq }
  0x38   : > { %1195 = vset.pattern.permute.xlu1 %v1332_v0  ;;  %1194 = vset.pattern.permute.xlu0 %v1332_v0  ;;  %v189_v2 = vld [vmem:[%s1789_s2] sm:$0xf]  ;;  %v1335_v5 = vmov 1   ;;  %v1336_v7 = vmov 3   ;;  %s1337_s10 = smov 16   ;;  %v1338_v8 = vmov 4  }
  0x39   : > { %192 = vperm.xlu0 %1194, %v189_v2   ;;  %262 = vperm.xlu1 %1195, %v1515_v1   ;;  %v1521_v3 = vld [vmem:[%s164_s7] sm:$0xff]  ;;  %v1339_v9 = vmov 5   ;;  %v1340_v10 = vmov 7   ;;  %v1341_v11 = vmov 6   ;;  %v1342_v12 = vmov 8   ;;  %s1343_s11 = smov 15  }
  0x3a   : > { %v1527_v6 = vcombine.high %v1521_v3, %v1521_v3  ;;  %v1344_v13 = vmov 11   ;;  %v1345_v14 = vmov 9   ;;  %s1346_s17 = smov 1   ;;  %v1347_v15 = vmov 14   ;;  %s1353_s19 = smov 127  }
  0x3b   : > { %v1348_v16 = vmov 10   ;;  %v1349_v17 = vmov 17   ;;  %v1350_v18 = vmov 12   ;;  %v1351_v19 = vmov 20   ;;  %s1356_s20 = smov 113   ;;  %s1372_s22 = smov 112  }
  0x3c   : > { %v1352_v20 = vmov 13   ;;  %v1354_v21 = vmov 23   ;;  %v1355_v22 = vmov 15   ;;  %v1357_v23 = vmov 26   ;;  %s1375_s26 = smov 111   ;;  %s1103_s27 = sshll.u32 %s1418_s16, 7 }
  0x3d   : > { %1197 = vset.pattern.permute.xlu1 %v1333_v4  ;;  %225 = vrot.lane.b32.xlu0 %v1521_v3, %s1334_s23  ;;  %v1358_v24 = vmov 16   ;;  %v1359_v25 = vmov 29   ;;  %v1360_v26 = vmov 18   ;;  %v1361_v27 = vmov 30   ;;  %s186_s28 = scalar_lea.vmem [#allocation5], %s1095_s30  ;;  %s1743_s6 = scalar_lea.hbm %s1790_s3, %s1103_s27 }
  0x3e   : > { %294 = vperm.xlu1 %1197, %v1515_v1   ;;  %1196 = vset.pattern.permute.xlu0 %v1335_v5  ;;  %v1362_v28 = vmov 19   ;;  %v1363_v29 = vmov 33   ;;  %v1364_v30 = vmov 21   ;;  %v1365_v31 = vmov 34   ;;  %s1018_s5 = sshll.u32 %s186_s28, 4  ;;  %s1004_s8 = scalar_lea.sflag [#allocation4], %s1502_s29  ;;  %s1745_s5 = int_to_ptr.vmem [resolvable:$true] %s1018_s5 }
  0x3f   : > { %v1366_v32 = vmov 22   ;;  %v1367_v33 = vmov 35   ;;  %v1368_v34 = vmov 24   ;;  %v1369_v35 = vmov 25   ;;  %s1263_s9 = scalar_lea.vmem %s1745_s5, 128  ;;  %p1799_p11 = scmp.ne.s32.totalorder %s1794_s24, 0 }
  0x40   : > { %v1370_v36 = vmov 27   ;;  %v1371_v37 = vmov 28   ;;  %v1373_v39 = vmov 31   ;;  %v1576_v40 = vand.u32 127, %v195_v38  ;;  %p1264_p6 = scmp.ne.s32.totalorder %s1745_s5, %s1263_s9  ;;  %s1376_s16 = smov [#allocation5]  }
  0x41   : > { %278 = vperm.xlu0 %1196, %v1515_v1   ;;  %v1374_v45 = vmov 32   ;;  %v253_v50 = vshrl.u32 %v195_v38, 7  ;;  %s1267_s30 = sshll.u32 %s1376_s16, 4  ;;  %s1268_s30 = int_to_ptr.vmem [resolvable:$false] %s1267_s30 }
  0x42   : > { %227 = vrot.lane.b32.xlu1 %v1527_v6, %s1334_s23  ;;  %v1580_v41 = vadd.s32 128, %v1576_v40  ;;  %v202_v42 = vand.u32 15, %v1576_v40  ;;  %v232_v46 = vadd.s32 4294967279, %v1576_v40  ;;  %vm229_vm2 = vcmp.lt.s32.totalorder %v1576_v40, 17  ;;  %p1265_p12 = pnand %p1264_p6, %p1799_p11  ;;  %s1269_s23 = scalar_lea.vmem %s1268_s30, 256 }
  0x43   : > { %1198 = vset.pattern.permute.xlu1 %v1336_v7  ;;  %v1601_v52 = vsub.s32 0, %v253_v50  ;;  %v1603_v53 = vsub.s32 1, %v253_v50  ;;  %v1605_v56 = vsub.s32 2, %v253_v50  ;;  %vm321_vm5 = vcmp.lt.s32.totalorder %v1576_v40, 16  ;;  %p1270_p7 = scmp.lt.s32.totalorder %s1745_s5, %s1268_s30  ;;  %p1271_p10 = scmp.lt.s32.totalorder %s1269_s23, %s1263_s9 }
  0x44   : > { %v209_v44 = vand.u32 15, %v1580_v41  ;;  %v1588_v47 = vadd.s32 4294967295, %v202_v42  ;;  %vm234_vm0 = vcmp.ge.s32.totalorder %v232_v46, 0  ;;  %vm410_vm7 = vcmp.lt.s32.totalorder %v1576_v40, 15  ;;  %p1266_p13 = pneg %p1265_p12 }
  0x45   : > { %317 = vrot.lane.b32.xlu0 %v1521_v3, %s1337_s10  ;;  %vm501_vm12 = vcmp.lt.s32.totalorder %v1576_v40, 1  ;;  %vm662_vm15 = vcmp.lt.s32.totalorder %v1576_v40, 127  ;;  %p1272_p2 = por %p1271_p10, %p1270_p7 }
  0x46   : > { %310 = vperm.xlu1 %1198, %v1515_v1   ;;  %1199 = vset.pattern.permute.xlu0 %v1338_v8  ;;  %v1593_v49 = vadd.s32 4294967295, %v209_v44  ;;  %vm242_vm1 = vcmp.ge.s32.totalorder %v1588_v47, 0 }
  0x47   : > { %vm244_vm4 = vmand %vm234_vm0, %vm242_vm1  ;;  %p1273_p4 = pnand %p1272_p2, %p1266_p13 }
  0x48   : > { %vm243_vm3 = vcmp.ge.s32.totalorder %v1593_v49, 0 }
  0x49   : > { %351 = vperm.xlu0 %1199, %v1515_v1  }
  0x4a   : > { %319 = vrot.lane.b32.xlu1 %v1527_v6, %s1337_s10 }
  0x4b   : > { %1200 = vset.pattern.permute.xlu1 %v1339_v9 }
  0x4d   : > { %1202 = vset.pattern.permute.xlu0 %v1340_v10 }
  0x4e   : > { %399 = vperm.xlu0 %1202, %v1515_v1   ;;  %367 = vperm.xlu1 %1200, %v1515_v1  }
  0x52   : > { %1201 = vset.pattern.permute.xlu1 %v1341_v11  ;;  %1203 = vset.pattern.permute.xlu0 %v1342_v12 }
  0x53   : > { %383 = vperm.xlu1 %1201, %v1515_v1   ;;  %442 = vperm.xlu0 %1203, %v1515_v1  }
  0x57   : > { %406 = vrot.lane.b32.xlu1 %v1521_v3, %s1343_s11  ;;  %1206 = vset.pattern.permute.xlu0 %v1344_v13 }
  0x58   : > { %1204 = vset.pattern.permute.xlu1 %v1345_v14  ;;  %490 = vperm.xlu0 %1206, %v1515_v1  }
  0x5b   : > { %408 = vrot.lane.b32.xlu1 %v1527_v6, %s1343_s11 }
  0x5c   : > { %497 = vrot.lane.b32.xlu0 %v1521_v3, %s1346_s17 }
  0x5d   : > { %1209 = vset.pattern.permute.xlu0 %v1347_v15 }
  0x5f   : > { %458 = vperm.xlu1 %1204, %v1515_v1  }
  0x60   : > { %559 = vperm.xlu0 %1209, %v1515_v1  }
  0x63   : > { %1205 = vset.pattern.permute.xlu1 %v1348_v16 }
  0x64   : > { %474 = vperm.xlu1 %1205, %v1515_v1   ;;  %1212 = vset.pattern.permute.xlu0 %v1349_v17 }
  0x65   : > { %619 = vperm.xlu0 %1212, %v1515_v1  }
  0x68   : > { %1207 = vset.pattern.permute.xlu1 %v1350_v18 }
  0x69   : > { %527 = vperm.xlu1 %1207, %v1515_v1   ;;  %1215 = vset.pattern.permute.xlu0 %v1351_v19 }
  0x6a   : > { %688 = vperm.xlu0 %1215, %v1515_v1  }
  0x6d   : > { %1208 = vset.pattern.permute.xlu1 %v1352_v20 }
  0x6e   : > { %543 = vperm.xlu1 %1208, %v1515_v1   ;;  %660 = vrot.lane.b32.xlu0 %v1527_v6, %s1353_s19 }
  0x6f   : > { %1218 = vset.pattern.permute.xlu0 %v1354_v21 }
  0x72   : > { %499 = vrot.lane.b32.xlu1 %v1527_v6, %s1346_s17  ;;  %736 = vperm.xlu0 %1218, %v1515_v1  }
  0x73   : > { %1210 = vset.pattern.permute.xlu1 %v1355_v22  ;;  %v324_v22 = vadd.s32 4294967280, %v1576_v40 }
  0x75   : > { %vm326_vm6 = vcmp.ge.s32.totalorder %v324_v22, 0 }
  0x76   : > { %575 = vperm.xlu1 %1210, %v1515_v1   ;;  %743 = vrot.lane.b32.xlu0 %v1521_v3, %s1356_s20 }
  0x77   : > { %1221 = vset.pattern.permute.xlu0 %v1357_v23 }
  0x7a   : > { %1211 = vset.pattern.permute.xlu1 %v1358_v24  ;;  %805 = vperm.xlu0 %1221, %v1515_v1  }
  0x7b   : > { %603 = vperm.xlu1 %1211, %v1515_v1  }
  0x7e   : > { %1224 = vset.pattern.permute.xlu0 %v1359_v25 }
  0x7f   : > { %1213 = vset.pattern.permute.xlu1 %v1360_v26  ;;  %874 = vperm.xlu0 %1224, %v1515_v1  }
  0x80   : > { %635 = vperm.xlu1 %1213, %v1515_v1  }
  0x83   : > { %1225 = vset.pattern.permute.xlu0 %v1361_v27 }
  0x84   : > { %1214 = vset.pattern.permute.xlu1 %v1362_v28  ;;  %890 = vperm.xlu0 %1225, %v1515_v1  }
  0x85   : > { %651 = vperm.xlu1 %1214, %v1515_v1  }
  0x88   : > { %1228 = vset.pattern.permute.xlu0 %v1363_v29 }
  0x89   : > { %1216 = vset.pattern.permute.xlu1 %v1364_v30  ;;  %959 = vperm.xlu0 %1228, %v1515_v1  }
  0x8a   : > { %704 = vperm.xlu1 %1216, %v1515_v1  }
  0x8d   : > { %1229 = vset.pattern.permute.xlu0 %v1365_v31 }
  0x8e   : > { %658 = vrot.lane.b32.xlu1 %v1521_v3, %s1353_s19  ;;  %975 = vperm.xlu0 %1229, %v1515_v1  }
  0x8f   : > { %1217 = vset.pattern.permute.xlu1 %v1366_v32 }
  0x92   : > { %720 = vperm.xlu1 %1217, %v1515_v1   ;;  %1231 = vset.pattern.permute.xlu0 %v1367_v33 }
  0x96   : > { %1219 = vset.pattern.permute.xlu1 %v1368_v34 }
  0x97   : > { %773 = vperm.xlu1 %1219, %v1515_v1  }
  0x9b   : > { %1220 = vset.pattern.permute.xlu1 %v1369_v35  ;;  %v413_v35 = vadd.s32 4294967281, %v1576_v40 }
  0x9c   : > { %789 = vperm.xlu1 %1220, %v1515_v1  }
  0x9d   : > { %vm415_vm8 = vcmp.ge.s32.totalorder %v413_v35, 0 }
  0xa0   : > { %745 = vrot.lane.b32.xlu1 %v1527_v6, %s1356_s20 }
  0xa1   : > { %1222 = vset.pattern.permute.xlu1 %v1370_v36  ;;  %v1628_v36 = vadd.s32 1, %v202_v42 }
  0xa3   : > { %vm427_vm9 = vcmp.lt.s32.totalorder %v1628_v36, 16 }
  0xa4   : > { %821 = vperm.xlu1 %1222, %v1515_v1   ;;  %vm429_vm11 = vmand %vm415_vm8, %vm427_vm9  ;;  %vm917_vm8 = vcmp.lt.s32.totalorder %v1576_v40, 111 }
  0xa8   : > { %1223 = vset.pattern.permute.xlu1 %v1371_v37 }
  0xa9   : > { %858 = vperm.xlu1 %1223, %v1515_v1  }
  0xad   : > { %828 = vrot.lane.b32.xlu1 %v1521_v3, %s1372_s22 }
  0xae   : > { %1226 = vset.pattern.permute.xlu1 %v1373_v39  ;;  %v1632_v39 = vadd.s32 1, %v209_v44 }
  0xb0   : > { %vm428_vm10 = vcmp.lt.s32.totalorder %v1632_v39, 16 }
  0xb1   : > { %830 = vrot.lane.b32.xlu1 %v1527_v6, %s1372_s22 }
  0xb5   : > { %906 = vperm.xlu1 %1226, %v1515_v1  }
  0xb8   : > { %v263_v43 = vpop.permute.xlu1 %262  ;;  %v193_v48 = vpop.permute.xlu0 %192 }
  0xb9   : > { %1227 = vset.pattern.permute.xlu1 %v1374_v45 }
  0xba   : > { %943 = vperm.xlu1 %1227, %v1515_v1  }
  0xbc   : > { %v226_v54 = vpop.permute.xlu0 %225 }
  0xbd   : > { %v295_v51 = vpop.permute.xlu1 %294 }
  0xbe   : > { %913 = vrot.lane.b32.xlu1 %v1521_v3, %s1375_s26 }
  0xbf   : > { %1230 = vset.pattern.permute.xlu1 %v1367_v33 }
  0xc0   : > { %v279_v9 = vpop.permute.xlu0 %278 }
  0xc1   : > { %v228_v55 = vpop.permute.xlu1 %227 }
  0xc2   : > { %v230_v57 = vsel %vm229_vm2, %v226_v54, %v228_v55  ;;  %v231_v58 = vsel %vm229_vm2, %v228_v55, %v226_v54  ;;  %915 = vrot.lane.b32.xlu1 %v1527_v6, %s1375_s26 }
  0xc3   : > { %v250_v59 = vsel %vm244_vm4, %v231_v58, 0.0  ;;  %v251_v60 = vsel %vm243_vm3, %v230_v57, 0.0 }
  0xc4   : > { %v255_v61 = vrot.slane %v250_v59, %v1601_v52  ;;  %v259_v62 = vrot.slane %v251_v60, %v1601_v52  ;;  %v272_v63 = vrot.slane %v250_v59, %v1603_v53  ;;  %v276_v0 = vrot.slane %v251_v60, %v1603_v53  ;;  %v318_v24 = vpop.permute.xlu0 %317 }
  0xc5   : > { %v311_v2 = vpop.permute.xlu1 %310  ;;  %v288_v7 = vrot.slane %v250_v59, %v1605_v56  ;;  %v292_v8 = vrot.slane %v251_v60, %v1605_v56 }
  0xc6   : > { %v265_v4 = vmul.f32 %v263_v43, %v255_v61  ;;  %v266_v5 = vmul.f32 %v263_v43, %v259_v62  ;;  %991 = vperm.xlu1 %1230, %v1515_v1   ;;  %v281_v10 = vmul.f32 %v279_v9, %v272_v63  ;;  %v282_v11 = vmul.f32 %v279_v9, %v276_v0 }
  0xc7   : > { %v297_v17 = vmul.f32 %v295_v51, %v288_v7  ;;  %v298_v18 = vmul.f32 %v295_v51, %v292_v8  ;;  %v1619_v1 = vsub.s32 3, %v253_v50 }
  0xc8   : > { %v267_v12 = vadd.f32 %v265_v4, %v193_v48  ;;  %v268_v13 = vadd.f32 %v266_v5, %v193_v48  ;;  %v352_v32 = vpop.permute.xlu0 %351 }
  0xc9   : > { %v320_v14 = vpop.permute.xlu1 %319  ;;  %v304_v29 = vrot.slane %v250_v59, %v1619_v1  ;;  %v308_v30 = vrot.slane %v251_v60, %v1619_v1 }
  0xca   : > { %v283_v15 = vadd.f32 %v281_v10, %v267_v12  ;;  %v284_v16 = vadd.f32 %v282_v11, %v268_v13  ;;  %v323_v25 = vsel %vm321_vm5, %v320_v14, %v318_v24  ;;  %v322_v27 = vsel %vm321_vm5, %v318_v24, %v320_v14 }
  0xcb   : > { %v340_v28 = vsel %vm326_vm6, %v323_v25, 0.0  ;;  %v349_v34 = vrot.slane %v322_v27, %v1601_v52  ;;  %v313_v37 = vmul.f32 %v311_v2, %v304_v29  ;;  %v314_v38 = vmul.f32 %v311_v2, %v308_v30 }
  0xcc   : > { %v299_v19 = vadd.f32 %v297_v17, %v283_v15  ;;  %v300_v20 = vadd.f32 %v298_v18, %v284_v16  ;;  %v345_v33 = vrot.slane %v340_v28, %v1601_v52  ;;  %v361_v42 = vrot.slane %v340_v28, %v1603_v53 }
  0xcd   : > { %v368_v21 = vpop.permute.xlu1 %367  ;;  %v355_v50 = vmul.f32 %v352_v32, %v349_v34  ;;  %v400_v51 = vpop.permute.xlu0 %399  ;;  %v365_v54 = vrot.slane %v322_v27, %v1603_v53  ;;  %v377_v62 = vrot.slane %v340_v28, %v1605_v56  ;;  %v381_v63 = vrot.slane %v322_v27, %v1605_v56 }
  0xce   : > { %v315_v45 = vadd.f32 %v313_v37, %v299_v19  ;;  %v316_v46 = vadd.f32 %v314_v38, %v300_v20  ;;  %v354_v48 = vmul.f32 %v352_v32, %v345_v33  ;;  %v370_v60 = vmul.f32 %v368_v21, %v361_v42 }
  0xcf   : > { %v371_v61 = vmul.f32 %v368_v21, %v365_v54  ;;  %v393_v11 = vrot.slane %v340_v28, %v1619_v1  ;;  %v397_v12 = vrot.slane %v322_v27, %v1619_v1  ;;  %v504_v15 = vadd.s32 4294967295, %v1576_v40 }
  0xd0   : > { %v356_v55 = vadd.f32 %v354_v48, %v315_v45  ;;  %v357_v44 = vadd.f32 %v355_v50, %v316_v46  ;;  %vm747_vm5 = vcmp.lt.s32.totalorder %v1576_v40, 113 }
  0xd1   : > { %v402_v19 = vmul.f32 %v400_v51, %v393_v11  ;;  %v403_v20 = vmul.f32 %v400_v51, %v397_v12  ;;  %vm506_vm13 = vcmp.ge.s32.totalorder %v504_v15, 0 }
  0xd2   : > { %v384_v23 = vpop.permute.xlu1 %383  ;;  %v443_v0 = vpop.permute.xlu0 %442  ;;  %v372_v5 = vadd.f32 %v370_v60, %v356_v55  ;;  %v373_v7 = vadd.f32 %v371_v61, %v357_v44  ;;  %vm512_vm14 = vmand %vm506_vm13, %vm242_vm1 }
  0xd3   : > { %v386_v8 = vmul.f32 %v384_v23, %v377_v62  ;;  %v387_v9 = vmul.f32 %v384_v23, %v381_v63 }
  0xd5   : > { %v388_v16 = vadd.f32 %v386_v8, %v372_v5  ;;  %v389_v17 = vadd.f32 %v387_v9, %v373_v7 }
  0xd6   : > { %v407_v26 = vpop.permute.xlu1 %406 }
  0xd7   : > { %v491_v18 = vpop.permute.xlu0 %490  ;;  %v404_v23 = vadd.f32 %v402_v19, %v388_v16  ;;  %v405_v25 = vadd.f32 %v403_v20, %v389_v17 }
  0xda   : > { %v409_v31 = vpop.permute.xlu1 %408 }
  0xdb   : > { %v411_v57 = vsel %vm410_vm7, %v407_v26, %v409_v31  ;;  %v412_v58 = vsel %vm410_vm7, %v409_v31, %v407_v26  ;;  %v498_v28 = vpop.permute.xlu0 %497 }
  0xdc   : > { %v431_v2 = vsel %vm429_vm11, %v412_v58, 0.0  ;;  %v432_v4 = vsel %vm428_vm10, %v411_v57, 0.0 }
  0xdd   : > { %v436_v13 = vrot.slane %v431_v2, %v1601_v52  ;;  %v440_v14 = vrot.slane %v432_v4, %v1601_v52  ;;  %v452_v26 = vrot.slane %v431_v2, %v1603_v53  ;;  %v456_v27 = vrot.slane %v432_v4, %v1603_v53 }
  0xde   : > { %v459_v43 = vpop.permute.xlu1 %458  ;;  %v468_v37 = vrot.slane %v431_v2, %v1605_v56  ;;  %v472_v38 = vrot.slane %v432_v4, %v1605_v56  ;;  %v484_v55 = vrot.slane %v431_v2, %v1619_v1  ;;  %v488_v44 = vrot.slane %v432_v4, %v1619_v1 }
  0xdf   : > { %v445_v21 = vmul.f32 %v443_v0, %v436_v13  ;;  %v446_v22 = vmul.f32 %v443_v0, %v440_v14  ;;  %v461_v34 = vmul.f32 %v459_v43, %v452_v26  ;;  %v462_v35 = vmul.f32 %v459_v43, %v456_v27  ;;  %v560_v2 = vpop.permute.xlu0 %559 }
  0xe0   : > { %v493_v62 = vmul.f32 %v491_v18, %v484_v55  ;;  %v494_v63 = vmul.f32 %v491_v18, %v488_v44 }
  0xe1   : > { %v447_v29 = vadd.f32 %v445_v21, %v404_v23  ;;  %v448_v30 = vadd.f32 %v446_v22, %v405_v25 }
  0xe3   : > { %v475_v59 = vpop.permute.xlu1 %474  ;;  %v463_v48 = vadd.f32 %v461_v34, %v447_v29  ;;  %v464_v50 = vadd.f32 %v462_v35, %v448_v30  ;;  %v597_v30 = vrot.slane %v1521_v3, %v1601_v52  ;;  %v617_v34 = vrot.slane %v1527_v6, %v1603_v53 }
  0xe4   : > { %v477_v51 = vmul.f32 %v475_v59, %v468_v37  ;;  %v478_v42 = vmul.f32 %v475_v59, %v472_v38  ;;  %v620_v17 = vpop.permute.xlu0 %619 }
  0xe6   : > { %v479_v58 = vadd.f32 %v477_v51, %v463_v48  ;;  %v480_v60 = vadd.f32 %v478_v42, %v464_v50  ;;  %v623_v51 = vmul.f32 %v620_v17, %v617_v34 }
  0xe8   : > { %v528_v10 = vpop.permute.xlu1 %527  ;;  %v495_v7 = vadd.f32 %v493_v62, %v479_v58  ;;  %v496_v8 = vadd.f32 %v494_v63, %v480_v60 }
  0xe9   : > { %v689_v25 = vpop.permute.xlu0 %688 }
  0xed   : > { %v544_v24 = vpop.permute.xlu1 %543  ;;  %v661_v38 = vpop.permute.xlu0 %660 }
  0xf1   : > { %v500_v31 = vpop.permute.xlu1 %499 }
  0xf2   : > { %v502_v32 = vsel %vm501_vm12, %v498_v28, %v500_v31  ;;  %v503_v33 = vsel %vm501_vm12, %v500_v31, %v498_v28  ;;  %v666_v28 = vadd.s32 1, %v1580_v41  ;;  %v601_v31 = vrot.slane %v1527_v6, %v1601_v52 }
  0xf3   : > { %v516_v45 = vsel %vm512_vm14, %v503_v33, 0.0  ;;  %v517_v46 = vsel %vm243_vm3, %v502_v32, 0.0  ;;  %v613_v33 = vrot.slane %v1521_v3, %v1603_v53 }
  0xf4   : > { %v521_v57 = vrot.slane %v516_v45, %v1601_v52  ;;  %v525_v43 = vrot.slane %v517_v46, %v1601_v52  ;;  %v537_v59 = vrot.slane %v516_v45, %v1603_v53  ;;  %v541_v9 = vrot.slane %v517_v46, %v1603_v53 }
  0xf5   : > { %v576_v54 = vpop.permute.xlu1 %575  ;;  %v553_v15 = vrot.slane %v516_v45, %v1605_v56  ;;  %v557_v16 = vrot.slane %v517_v46, %v1605_v56  ;;  %v569_v22 = vrot.slane %v516_v45, %v1619_v1  ;;  %v573_v23 = vrot.slane %v517_v46, %v1619_v1 }
  0xf6   : > { %v530_v0 = vmul.f32 %v528_v10, %v521_v57  ;;  %v531_v5 = vmul.f32 %v528_v10, %v525_v43  ;;  %v546_v13 = vmul.f32 %v544_v24, %v537_v59  ;;  %v547_v14 = vmul.f32 %v544_v24, %v541_v9 }
  0xf7   : > { %v562_v20 = vmul.f32 %v560_v2, %v553_v15  ;;  %v563_v21 = vmul.f32 %v560_v2, %v557_v16  ;;  %v578_v24 = vmul.f32 %v576_v54, %v569_v22  ;;  %v579_v29 = vmul.f32 %v576_v54, %v573_v23 }
  0xf8   : > { %v532_v11 = vadd.f32 %v530_v0, %v495_v7  ;;  %v533_v4 = vadd.f32 %v531_v5, %v496_v8  ;;  %vm670_vm0 = vcmp.lt.s32.totalorder %v666_v28, 256  ;;  %v622_v50 = vmul.f32 %v620_v17, %v613_v33 }
  0xf9   : > { %vm676_vm2 = vmand %vm670_vm0, %vm428_vm10  ;;  %v629_v57 = vrot.slane %v1521_v3, %v1605_v56  ;;  %v633_v43 = vrot.slane %v1527_v6, %v1605_v56  ;;  %v645_v0 = vrot.slane %v1521_v3, %v1619_v1  ;;  %v649_v5 = vrot.slane %v1527_v6, %v1619_v1 }
  0xfa   : > { %v604_v61 = vpop.permute.xlu1 %603  ;;  %v548_v18 = vadd.f32 %v546_v13, %v532_v11  ;;  %v549_v19 = vadd.f32 %v547_v14, %v533_v4  ;;  %v751_v11 = vadd.s32 15, %v1580_v41 }
  0xfb   : > { %v606_v45 = vmul.f32 %v604_v61, %v597_v30  ;;  %v607_v46 = vmul.f32 %v604_v61, %v601_v31 }
  0xfc   : > { %v564_v26 = vadd.f32 %v562_v20, %v548_v18  ;;  %v565_v27 = vadd.f32 %v563_v21, %v549_v19  ;;  %v737_v18 = vpop.permute.xlu0 %736  ;;  %vm755_vm4 = vcmp.lt.s32.totalorder %v751_v11, 256 }
  0xfd   : > { %vm759_vm6 = vmand %vm755_vm4, %vm243_vm3 }
  0xfe   : > { %v580_v35 = vadd.f32 %v578_v24, %v564_v26  ;;  %v581_v37 = vadd.f32 %v579_v29, %v565_v27 }
  0xff   : > { %v636_v12 = vpop.permute.xlu1 %635 }
 0x100   : > { %v608_v42 = vadd.f32 %v606_v45, %v580_v35  ;;  %v609_v54 = vadd.f32 %v607_v46, %v581_v37  ;;  %v638_v7 = vmul.f32 %v636_v12, %v629_v57  ;;  %v639_v8 = vmul.f32 %v636_v12, %v633_v43  ;;  %v744_v23 = vpop.permute.xlu0 %743 }
 0x102   : > { %v624_v62 = vadd.f32 %v622_v50, %v608_v42  ;;  %v625_v63 = vadd.f32 %v623_v51, %v609_v54 }
 0x104   : > { %v652_v10 = vpop.permute.xlu1 %651  ;;  %v640_v4 = vadd.f32 %v638_v7, %v624_v62  ;;  %v641_v13 = vadd.f32 %v639_v8, %v625_v63  ;;  %v836_v62 = vadd.s32 16, %v1580_v41 }
 0x105   : > { %v654_v14 = vmul.f32 %v652_v10, %v645_v0  ;;  %v655_v15 = vmul.f32 %v652_v10, %v649_v5 }
 0x106   : > { %vm840_vm3 = vcmp.lt.s32.totalorder %v836_v62, 256 }
 0x107   : > { %v656_v3 = vadd.f32 %v654_v14, %v640_v4  ;;  %v657_v19 = vadd.f32 %v655_v15, %v641_v13 }
 0x109   : > { %v705_v32 = vpop.permute.xlu1 %704 }
 0x10d   : > { %v659_v48 = vpop.permute.xlu1 %658 }
 0x10e   : > { %v663_v55 = vsel %vm662_vm15, %v659_v48, %v661_v38  ;;  %v664_v44 = vsel %vm662_vm15, %v661_v38, %v659_v48 }
 0x10f   : > { %v677_v60 = vsel %vm427_vm9, %v663_v55, 0.0  ;;  %v678_v61 = vsel %vm676_vm2, %v664_v44, 0.0 }
 0x110   : > { %v682_v59 = vrot.slane %v677_v60, %v1601_v52  ;;  %v686_v9 = vrot.slane %v678_v61, %v1601_v52  ;;  %v698_v6 = vrot.slane %v677_v60, %v1603_v53  ;;  %v702_v12 = vrot.slane %v678_v61, %v1603_v53 }
 0x111   : > { %v721_v58 = vpop.permute.xlu1 %720  ;;  %v718_v27 = vrot.slane %v678_v61, %v1605_v56  ;;  %v730_v35 = vrot.slane %v677_v60, %v1619_v1  ;;  %v734_v49 = vrot.slane %v678_v61, %v1619_v1 }
 0x112   : > { %v691_v16 = vmul.f32 %v689_v25, %v682_v59  ;;  %v692_v17 = vmul.f32 %v689_v25, %v686_v9  ;;  %v707_v10 = vmul.f32 %v705_v32, %v698_v6  ;;  %v708_v26 = vmul.f32 %v705_v32, %v702_v12  ;;  %v806_v59 = vpop.permute.xlu0 %805 }
 0x113   : > { %v714_v25 = vrot.slane %v677_v60, %v1605_v56  ;;  %v724_v38 = vmul.f32 %v721_v58, %v718_v27  ;;  %v739_v51 = vmul.f32 %v737_v18, %v730_v35  ;;  %v740_v42 = vmul.f32 %v737_v18, %v734_v49 }
 0x114   : > { %v693_v21 = vadd.f32 %v691_v16, %v656_v3  ;;  %v694_v22 = vadd.f32 %v692_v17, %v657_v19 }
 0x115   : > { %v723_v37 = vmul.f32 %v721_v58, %v714_v25 }
 0x116   : > { %v774_v2 = vpop.permute.xlu1 %773  ;;  %v709_v30 = vadd.f32 %v707_v10, %v693_v21  ;;  %v710_v31 = vadd.f32 %v708_v26, %v694_v22  ;;  %v875_v26 = vpop.permute.xlu0 %874 }
 0x118   : > { %v725_v48 = vadd.f32 %v723_v37, %v709_v30  ;;  %v726_v50 = vadd.f32 %v724_v38, %v710_v31 }
 0x11a   : > { %v741_v44 = vadd.f32 %v739_v51, %v725_v48  ;;  %v742_v57 = vadd.f32 %v740_v42, %v726_v50  ;;  %v891_v38 = vpop.permute.xlu0 %890 }
 0x11b   : > { %v790_v20 = vpop.permute.xlu1 %789 }
 0x11f   : > { %v746_v28 = vpop.permute.xlu1 %745 }
 0x120   : > { %v748_v24 = vsel %vm747_vm5, %v744_v23, %v746_v28  ;;  %v749_v29 = vsel %vm747_vm5, %v746_v28, %v744_v23 }
 0x121   : > { %v762_v33 = vsel %vm242_vm1, %v748_v24, 0.0  ;;  %v763_v34 = vsel %vm759_vm6, %v749_v29, 0.0  ;;  %vm832_vm1 = vcmp.lt.s32.totalorder %v1576_v40, 112 }
 0x122   : > { %v767_v32 = vrot.slane %v762_v33, %v1601_v52  ;;  %v771_v45 = vrot.slane %v763_v34, %v1601_v52  ;;  %v783_v43 = vrot.slane %v762_v33, %v1603_v53  ;;  %v787_v60 = vrot.slane %v763_v34, %v1603_v53 }
 0x123   : > { %v822_v46 = vpop.permute.xlu1 %821  ;;  %v799_v7 = vrot.slane %v762_v33, %v1605_v56  ;;  %v803_v8 = vrot.slane %v763_v34, %v1605_v56  ;;  %v815_v11 = vrot.slane %v762_v33, %v1619_v1  ;;  %v819_v4 = vrot.slane %v763_v34, %v1619_v1 }
 0x124   : > { %v776_v54 = vmul.f32 %v774_v2, %v767_v32  ;;  %v777_v55 = vmul.f32 %v774_v2, %v771_v45  ;;  %v792_v0 = vmul.f32 %v790_v20, %v783_v43  ;;  %v793_v5 = vmul.f32 %v790_v20, %v787_v60 }
 0x125   : > { %v808_v14 = vmul.f32 %v806_v59, %v799_v7  ;;  %v809_v15 = vmul.f32 %v806_v59, %v803_v8  ;;  %v824_v21 = vmul.f32 %v822_v46, %v815_v11  ;;  %v825_v22 = vmul.f32 %v822_v46, %v819_v4 }
 0x126   : > { %v778_v61 = vadd.f32 %v776_v54, %v741_v44  ;;  %v779_v58 = vadd.f32 %v777_v55, %v742_v57  ;;  %v921_v33 = vadd.s32 17, %v1580_v41  ;;  %v960_v55 = vpop.permute.xlu0 %959 }
 0x128   : > { %v859_v47 = vpop.permute.xlu1 %858  ;;  %v794_v9 = vadd.f32 %v792_v0, %v778_v61  ;;  %v795_v2 = vadd.f32 %v793_v5, %v779_v58  ;;  %vm925_vm7 = vcmp.lt.s32.totalorder %v921_v33, 256 }
 0x129   : > { %vm931_vm11 = vmand %vm925_vm7, %vm428_vm10 }
 0x12a   : > { %v810_v19 = vadd.f32 %v808_v14, %v794_v9  ;;  %v811_v6 = vadd.f32 %v809_v15, %v795_v2  ;;  %v976_v2 = vpop.permute.xlu0 %975 }
 0x12c   : > { %v829_v63 = vpop.permute.xlu1 %828  ;;  %v826_v25 = vadd.f32 %v824_v21, %v810_v19  ;;  %v827_v27 = vadd.f32 %v825_v22, %v811_v6 }
 0x130   : > { %v831_v13 = vpop.permute.xlu1 %830 }
 0x131   : > { %v833_v16 = vsel %vm832_vm1, %v829_v63, %v831_v13  ;;  %v834_v17 = vsel %vm832_vm1, %v831_v13, %v829_v63 }
 0x132   : > { %v848_v18 = vsel %vm840_vm3, %v834_v17, 0.0  ;;  %v852_v3 = vrot.slane %v833_v16, %v1601_v52  ;;  %v868_v28 = vrot.slane %v833_v16, %v1603_v53  ;;  %v884_v49 = vrot.slane %v833_v16, %v1605_v56 }
 0x133   : > { %v856_v12 = vrot.slane %v848_v18, %v1601_v52  ;;  %v872_v24 = vrot.slane %v848_v18, %v1603_v53  ;;  %v888_v37 = vrot.slane %v848_v18, %v1605_v56  ;;  %v900_v51 = vrot.slane %v833_v16, %v1619_v1 }
 0x134   : > { %v907_v20 = vpop.permute.xlu1 %906  ;;  %v861_v23 = vmul.f32 %v859_v47, %v852_v3  ;;  %v877_v34 = vmul.f32 %v875_v26, %v868_v28  ;;  %v893_v48 = vmul.f32 %v891_v38, %v884_v49  ;;  %v904_v42 = vrot.slane %v848_v18, %v1619_v1 }
 0x135   : > { %v862_v10 = vmul.f32 %v859_v47, %v856_v12  ;;  %v878_v35 = vmul.f32 %v875_v26, %v872_v24  ;;  %v894_v50 = vmul.f32 %v891_v38, %v888_v37  ;;  %v909_v43 = vmul.f32 %v907_v20, %v900_v51 }
 0x136   : > { %v863_v29 = vadd.f32 %v861_v23, %v826_v25  ;;  %v910_v60 = vmul.f32 %v907_v20, %v904_v42 }
 0x137   : > { %v864_v30 = vadd.f32 %v862_v10, %v827_v27 }
 0x138   : > { %v879_v32 = vadd.f32 %v877_v34, %v863_v29 }
 0x139   : > { %v944_v31 = vpop.permute.xlu1 %943  ;;  %v880_v45 = vadd.f32 %v878_v35, %v864_v30 }
 0x13a   : > { %v895_v41 = vadd.f32 %v893_v48, %v879_v32 }
 0x13b   : > { %v896_v54 = vadd.f32 %v894_v50, %v880_v45 }
 0x13c   : > { %v911_v0 = vadd.f32 %v909_v43, %v895_v41 }
 0x13d   : > { %v914_v46 = vpop.permute.xlu1 %913  ;;  %v912_v5 = vadd.f32 %v910_v60, %v896_v54 }
 0x141   : > { %v916_v47 = vpop.permute.xlu1 %915 }
 0x142   : > { %v918_v44 = vsel %vm917_vm8, %v914_v46, %v916_v47  ;;  %v919_v57 = vsel %vm917_vm8, %v916_v47, %v914_v46 }
 0x143   : > { %v932_v40 = vsel %vm427_vm9, %v918_v44, 0.0  ;;  %v933_v61 = vsel %vm931_vm11, %v919_v57, 0.0 }
 0x144   : > { %v937_v58 = vrot.slane %v932_v40, %v1601_v52  ;;  %v941_v62 = vrot.slane %v933_v61, %v1601_v52  ;;  %v953_v63 = vrot.slane %v932_v40, %v1603_v53  ;;  %v957_v39 = vrot.slane %v933_v61, %v1603_v53 }
 0x145   : > { %v969_v59 = vrot.slane %v932_v40, %v1605_v56  ;;  %v973_v9 = vrot.slane %v933_v61, %v1605_v56  ;;  %v985_v36 = vrot.slane %v932_v40, %v1619_v1  ;;  %v989_v11 = vrot.slane %v933_v61, %v1619_v1  ;;  %v992_v53 = vpop.permute.xlu1 %991 }
 0x146   : > { %v946_v7 = vmul.f32 %v944_v31, %v937_v58  ;;  %v947_v8 = vmul.f32 %v944_v31, %v941_v62  ;;  %v962_v13 = vmul.f32 %v960_v55, %v953_v63  ;;  %v963_v14 = vmul.f32 %v960_v55, %v957_v39 }
 0x147   : > { %v978_v17 = vmul.f32 %v976_v2, %v969_v59  ;;  %v979_v18 = vmul.f32 %v976_v2, %v973_v9  ;;  %v994_v19 = vmul.f32 %v992_v53, %v985_v36  ;;  %v995_v6 = vmul.f32 %v992_v53, %v989_v11 }
 0x148   : > { %v948_v52 = vadd.f32 %v946_v7, %v911_v0  ;;  %v949_v4 = vadd.f32 %v947_v8, %v912_v5 }
 0x14a   : > { %v964_v15 = vadd.f32 %v962_v13, %v948_v52  ;;  %v965_v16 = vadd.f32 %v963_v14, %v949_v4 }
 0x14c   : > { %v980_v3 = vadd.f32 %v978_v17, %v964_v15  ;;  %v981_v56 = vadd.f32 %v979_v18, %v965_v16 }
 0x14e   : > { %v996_v1 = vadd.f32 %v994_v19, %v980_v3  ;;  %v997_v12 = vadd.f32 %v995_v6, %v981_v56 }
 0x150   : > { %v1000_v20 = vcombine.low %v996_v1, %v997_v12 }
 0x152   : > { %1002 = vst [vmem:[%s186_s28] sm:$0xff] %v1000_v20 }
 0x153   : > { %1276 = shalt.err (!%p1273_p4)
}
 0x154   : > { %s1277_s29 = scalar_lea.hbm %s1743_s6, 128  ;;  %s1281_s17 = scalar_lea.hbm %s1790_s3, 256 }
 0x155   : > { %p1278_p5 = scmp.ne.s32.totalorder %s1743_s6, %s1277_s29  ;;  %p1282_p0 = scmp.lt.u32.totalorder %s1743_s6, %s1790_s3 }
 0x156   : > { %p1283_p1 = scmp.lt.u32.totalorder %s1281_s17, %s1277_s29  ;;  %p1285_p6 = scmp.lt.u32.totalorder %s1277_s29, %s1743_s6 }
 0x157   : > { %p1279_p8 = pnand %p1278_p5, %p1799_p11 }
 0x158   : > { %p1284_p3 = por %p1283_p1, %p1282_p0 }
 0x159   : > { %p1280_p9 = pneg %p1279_p8 }
 0x15a   : > { %p1286_p12 = por %p1285_p6, %p1284_p3 }
 0x15c   : > { %p1287_p13 = pnand %p1286_p12, %p1280_p9 }
 0x15e   : > { %1290 = shalt.err (!%p1287_p13)
}
 0x15f   : > { %1106 = dma.vmem_to_hbm [thread:$0]  (%p1799_p11), %s1745_s5, 128, %s1743_s6, %s1004_s8  }
 0x160 PF: > { %s1030_s22 = sand.u32 1, %s1317_s12   ;;  %p1800_p7 = scmp.ne.s32.totalorder %s1795_s25, 0 }
 0x161   : > { %p1801_p10 = scmp.ge.s32.totalorder %s1329_s15, 2  ;;  %s1031_s26 = scalar_lea.sflag [#allocation4], %s1030_s22 }
 0x163   : > { %p1113_p2 = pnand %p1801_p10, %p1800_p7 }
 0x165   : > { %1312 = dma.done.wait (!%p1113_p2), %s1031_s26, 128  }
 0x166   : > { %1314 = vsyncadd (!%p1113_p2), %s1031_s26, 4294967168  ;;  %p16_p4 = scmp.ge.s32.totalorder %s1422_s18, 4   ;;  %s1802_s12 = smov %s1321_s13 }
 0x167   : > { %s1803_s13 = smov %s1325_s14  ;;  %s1804_s14 = smov %s1434_s21 }
 0x168   : > { %s1805_s15 = smov %s1422_s18  ;;  %18 = sbr.rel (!%p16_p4) target bundleno = 5 (0x5), region = 77 }
 0x16f   :  { %1036 = vsyncpa [#allocation3], 1 }
 0x170   :  { %1038 = vsyncpa [#allocation3 + $0x1], 1 }
 0x171   :  { %1039 = vsyncpa [#allocation4], 1 }
 0x172   :  { %1041 = vsyncpa [#allocation4 + $0x1], 1 }

</bundles_post_ra>
